<compile_context>
chip_gen: v7x
topology: tpu7x:2x2x1
jax: 0.10.0
libtpu: 0.0.40
codegen_flags: <defaults>
</compile_context>

<pallas_src>
import functools

import jax
import jax.numpy as jnp
from jax.experimental import pallas as pl
from jax.experimental.pallas import tpu as pltpu

NEG_SLOPE = 0.2          # nn.LeakyReLU(negative_slope=0.2)
LANES = 128              # TPU lane width

_CHIP_CFG = None


def _chip_config():
    """Chip-gated tiling: big tiles on v5e/v6e (128 MiB physical VMEM, 1 TC),
    smaller tiles + a Cout split (grid >= 2 for megacore) on v7x (64 MiB, 2 TC)."""
    global _CHIP_CFG
    if _CHIP_CFG is None:
        try:
            vmem = getattr(pltpu.get_tpu_info(), "vmem_capacity_bytes",
                           128 * 1024 * 1024)
        except Exception:   # interpret / mocked / non-TPU backends
            vmem = 128 * 1024 * 1024
        if vmem <= 96 * 1024 * 1024:   # v7x-class part (64 MiB per TensorCore)
            _CHIP_CFG = dict(tm_cap=1024, vmem_limit=32 * 1024 * 1024, cout_split=2)
        else:                          # v5e / v6e (128 MiB physical)
            _CHIP_CFG = dict(tm_cap=4096, vmem_limit=64 * 1024 * 1024, cout_split=1)
    return _CHIP_CFG


# ----------------------------------------------------------------------------
# Pallas kernel: fused conv-as-matmul (+bias) + LeakyReLU (+ fused 2x2-avg skip)
# ----------------------------------------------------------------------------
def _conv_kernel(*refs, has_bias, has_residual):
    """out(Cout_blk, TM) = leaky_relu(W @ patches [+ b]) [+ R @ patches], bf16 out."""
    if has_bias and has_residual:
        w_ref, b_ref, r_ref, p_ref, o_ref = refs
    elif has_bias:
        w_ref, b_ref, p_ref, o_ref = refs
        r_ref = None
    elif has_residual:
        w_ref, r_ref, p_ref, o_ref = refs
        b_ref = None
    else:
        w_ref, p_ref, o_ref = refs
        b_ref = r_ref = None

    # MXU: bf16 operands, f32 accumulation.
    acc = jnp.dot(w_ref[...], p_ref[...], preferred_element_type=jnp.float32)
    if has_bias:
        acc = acc + b_ref[...]                     # (Cout_blk, 1) broadcast over lanes
    acc = jnp.maximum(acc, NEG_SLOPE * acc)        # LeakyReLU(0.2): mul + max

    if has_residual:
        # bilinear(scale=0.5) skip of the conv input == 2x2 avg pool of the centre
        # taps of the 4x4/stride-2/pad-1 window == R @ patches with R a constant
        # 0.25-diagonal selector.  Second matmul rides the mostly idle MXU slot.
        acc = acc + jnp.dot(r_ref[...], p_ref[...], preferred_element_type=jnp.float32)

    o_ref[...] = acc.astype(o_ref.dtype)           # bf16 writeback


# ----------------------------------------------------------------------------
# Plain-JAX glue: K-major im2col (channel-major activations, no transposes)
# ----------------------------------------------------------------------------
def im2col_kmajor(x_cnhw, kh, kw, stride, pad):
    """x: (C, N, H, W) -> patches (K, M); K = (tap, cin) major, M = (n, oh, ow)."""
    C, N, H, W = x_cnhw.shape
    xp = jnp.pad(x_cnhw, ((0, 0), (0, 0), (pad, pad), (pad, pad)))
    OH = (H + 2 * pad - kh) // stride + 1
    OW = (W + 2 * pad - kw) // stride + 1
    taps = []
    for i in range(kh):
        for j in range(kw):
            taps.append(xp[:, :, i:i + stride * OH:stride, j:j + stride * OW:stride])
    p = jnp.stack(taps, axis=0)                    # (kh*kw, C, N, OH, OW)
    return p.reshape(kh * kw * C, N * OH * OW), OH, OW


def _round_up(v, m):
    return -(-v // m) * m


def conv2d_pallas(x_cnhw, w_mat, bias, r_mat, kh, kw, stride, pad):
    """Conv2d (+bias) + LeakyReLU(0.2) (+ fused bilinear-0.5 skip of the input).

    x_cnhw : (Cin, N, H, W) bf16.     w_mat : (Cout, K_pad) bf16 (prepped).
    bias   : (Cout, 1) f32 or None.   r_mat : (Cout, K_pad) bf16 or None.
    Returns (Cout, N, OH, OW) bf16.
    """
    cfg = _chip_config()
    N = x_cnhw.shape[1]
    Cout, K_pad = w_mat.shape

    patches, OH, OW = im2col_kmajor(x_cnhw, kh, kw, stride, pad)   # (K, M) bf16
    K, M = patches.shape
    M_pad = _round_up(M, LANES)
    if M_pad != M or K_pad != K:
        patches = jnp.pad(patches, ((0, K_pad - K), (0, M_pad - M)))
    patches = patches.astype(jnp.bfloat16)

    # Largest M-tile (multiple of 128, <= chip TM cap) that divides M_pad.
    TM = min(cfg["tm_cap"], M_pad)
    while M_pad % TM:
        TM -= LANES
    num_m = M_pad // TM

    # Cout split: on v7x guarantees grid >= 2 so megacore shards work; blocks
    # stay a multiple of 16 rows (bf16 sublane packing).
    cout_split = cfg["cout_split"]
    if Cout % (cout_split * 16) != 0:
        cout_split = 1
    cout_blk = Cout // cout_split

    kern = functools.partial(_conv_kernel,
                             has_bias=bias is not None,
                             has_residual=r_mat is not None)

    in_arrays = [w_mat]
    in_specs = [pl.BlockSpec((cout_blk, K_pad), lambda i, j: (j, 0))]   # resident W
    if bias is not None:
        in_arrays.append(bias)
        in_specs.append(pl.BlockSpec((cout_blk, 1), lambda i, j: (j, 0)))
    if r_mat is not None:
        in_arrays.append(r_mat)
        in_specs.append(pl.BlockSpec((cout_blk, K_pad), lambda i, j: (j, 0)))
    patch_kwargs = {}
    if K_pad <= 64 and num_m >= 3:
        # Thin-K layers (conv0) are DMA-bound: buffer the patch stream deeper.
        patch_kwargs["pipeline_mode"] = pl.Buffered(3)
    in_arrays.append(patches)
    in_specs.append(pl.BlockSpec((K_pad, TM), lambda i, j: (0, i), **patch_kwargs))

    flops = 2 * M_pad * K_pad * Cout * (2 if r_mat is not None else 1)
    bytes_accessed = (int(w_mat.size) * 2 + int(patches.size) * 2 + Cout * M_pad * 2
                      + (int(r_mat.size) * 2 if r_mat is not None else 0)
                      + (int(bias.size) * 4 if bias is not None else 0))

    out = pl.pallas_call(
        kern,
        grid=(num_m, cout_split),
        in_specs=in_specs,
        out_specs=pl.BlockSpec((cout_blk, TM), lambda i, j: (j, i)),
        out_shape=jax.ShapeDtypeStruct((Cout, M_pad), jnp.bfloat16),
        compiler_params=pltpu.CompilerParams(
            dimension_semantics=("parallel", "parallel"),
            vmem_limit_bytes=cfg["vmem_limit"]),
        cost_estimate=pl.CostEstimate(
            flops=int(flops), transcendentals=0, bytes_accessed=int(bytes_accessed)),
    )(*in_arrays)

    if M_pad != M:
        out = out[:, :M]
    return out.reshape(Cout, N, OH, OW)


# ----------------------------------------------------------------------------
# Parameter setup (spectral-norm prep + weight prep are init-time plain JAX)
# ----------------------------------------------------------------------------
def spectral_normalize(w, n_iter=50, eps=1e-12):
    """torch.nn.utils.spectral_norm on 'weight' (deterministic power iteration)."""
    m = w.reshape(w.shape[0], -1)
    u = jax.random.normal(jax.random.PRNGKey(42), (m.shape[0],), jnp.float32)
    u = u / (jnp.linalg.norm(u) + eps)
    v = None
    for _ in range(n_iter):
        v = m.T @ u
        v = v / (jnp.linalg.norm(v) + eps)
        u = m @ v
        u = u / (jnp.linalg.norm(u) + eps)
    sigma = u @ (m @ v)
    return w / sigma


def init_params(key, num_in_ch=3, num_feat=64):
    ks = jax.random.split(key, 9)

    def u(k, shape, scale):
        return jax.random.uniform(k, shape, jnp.float32, -scale, scale)

    p = {}
    p["conv0_w"] = u(ks[0], (num_feat, num_in_ch, 3, 3), 0.1)
    p["conv0_b"] = u(ks[1], (num_feat,), 0.1)
    p["conv1_w"] = spectral_normalize(u(ks[2], (num_feat, num_feat, 4, 4), 0.05))
    p["conv2_w"] = spectral_normalize(u(ks[3], (num_feat, num_feat, 4, 4), 0.05))
    # conv3 is defined in the module but unused (reference forward reuses conv2).
    p["conv3_w"] = spectral_normalize(u(ks[4], (num_feat, num_feat, 4, 4), 0.05))
    p["final_w"] = spectral_normalize(u(ks[5], (16, num_feat, 4, 4), 0.05))
    p["final_b"] = u(ks[6], (16,), 0.1)
    p["lin_w"] = u(ks[7], (1, 16), 0.25)   # nn.Linear(16, 1) weight, PyTorch layout
    p["lin_b"] = u(ks[8], (1,), 0.25)
    return p


def prepare_params(params):
    """One-time weight prep (transpose+pad+bf16 cast) done OUTSIDE the jitted forward."""
    def prep_w(w):
        Cout, Cin, KH, KW = w.shape
        K = KH * KW * Cin
        K_pad = _round_up(K, 16)
        wm = jnp.transpose(w, (0, 2, 3, 1)).reshape(Cout, K)   # K index = tap*Cin + c
        if K_pad != K:
            wm = jnp.pad(wm, ((0, 0), (0, K_pad - K)))
        return wm.astype(jnp.bfloat16)

    p = {
        "conv0_w": prep_w(params["conv0_w"]),
        "conv0_b": params["conv0_b"].reshape(-1, 1).astype(jnp.float32),
        "conv1_w": prep_w(params["conv1_w"]),
        "conv2_w": prep_w(params["conv2_w"]),
        "final_w": prep_w(params["final_w"]),
        "final_b": params["final_b"].reshape(-1, 1).astype(jnp.float32),
        "lin_w": params["lin_w"].astype(jnp.float32),
        "lin_b": params["lin_b"].astype(jnp.float32),
    }

    # Constant residual matrix R for the 4x4/stride-2/pad-1 layers: bilinear(0.5)
    # of the layer input == mean of the centre 2x2 taps (tap idx 5,6,9,10).
    nf = params["conv1_w"].shape[0]
    K_pad = p["conv1_w"].shape[1]
    rows = jnp.arange(nf)
    r = jnp.zeros((nf, K_pad), jnp.float32)
    for t in (5, 6, 9, 10):
        r = r.at[rows, t * nf + rows].set(0.25)
    p["pool_r"] = r.astype(jnp.bfloat16)
    return p


# ----------------------------------------------------------------------------
# Forward pass (matches resgan.forward with attention=False -> Identity)
# ----------------------------------------------------------------------------
def resgan_forward(x_nchw, p):
    # Channel-major (C, N, H, W) bf16 activations: lane-dense (Cout, M) kernel
    # outputs feed the next layer's im2col with no transposes and half the HBM.
    x = jnp.transpose(x_nchw, (1, 0, 2, 3)).astype(jnp.bfloat16)

    # x0 = act(conv0(x))
    x0 = conv2d_pallas(x, p["conv0_w"], p["conv0_b"], None, 3, 3, 1, 1)
    # x1 = act(conv1(x0)) + bilinear_0.5(x0)       (skip fused into the kernel)
    x1 = conv2d_pallas(x0, p["conv1_w"], None, p["pool_r"], 4, 4, 2, 1)
    # x2 = act(conv2(x1)) + bilinear_0.5(x1)
    x2 = conv2d_pallas(x1, p["conv2_w"], None, p["pool_r"], 4, 4, 2, 1)
    # x3 = act(conv2(x2)) + bilinear_0.5(x2)       (reference reuses conv2, not conv3)
    x3 = conv2d_pallas(x2, p["conv2_w"], None, p["pool_r"], 4, 4, 2, 1)
    # x4 = act(final_conv(x3))
    x4 = conv2d_pallas(x3, p["final_w"], p["final_b"], None, 4, 4, 2, 1)

    # Head: AdaptiveAvgPool2d(1) + Linear(16, 1). Plain JAX — a separate
    # pallas_call here is dominated by launch overhead for a (N,16)@(16,1).
    C4, N, OH, OW = x4.shape
    pooled = x4.astype(jnp.float32).reshape(C4, N, OH * OW).mean(axis=-1)   # (16, N)
    out = p["lin_w"] @ pooled + p["lin_b"][:, None]                         # (1, N)
    return out.T                                                            # (N, 1)


if __name__ == "__main__":
    key = jax.random.PRNGKey(0)
    pkey, xkey = jax.random.split(key)
    params = init_params(pkey)
    prepped = prepare_params(params)          # once, outside the jitted forward
    x = jax.random.normal(xkey, (2, 3, 16, 16), jnp.float32)  # NCHW like PyTorch

    out = jax.jit(resgan_forward)(x, prepped)
    out = jax.block_until_ready(out)
    assert out.shape == (2, 1) and out.dtype == jnp.float32
    print("KERNEL_OK")
</pallas_src>

<mosaic_0001>
module attributes {stable_mosaic.version = 11 : i64} {
  func.func @_conv_kernel(%arg0: i32, %arg1: i32, %arg2: memref<64x32xbf16, #tpu.memory_space<vmem>>, %arg3: memref<64x1xf32, #tpu.memory_space<vmem>>, %arg4: memref<32x512xbf16, #tpu.memory_space<vmem>>, %arg5: memref<64x512xbf16, #tpu.memory_space<vmem>>) attributes {dimension_semantics = [#tpu.dimension_semantics<parallel>, #tpu.dimension_semantics<parallel>], iteration_bounds = array<i64: 1, 1>, scalar_prefetch = 0 : i64, scratch_operands = 0 : i64, tpu.core_type = #tpu.core_type<tc>, window_params = [{transform_indices = @transform_0, window_bounds = array<i64: 64, 32>}, {transform_indices = @transform_1, window_bounds = array<i64: 64, 1>}, {transform_indices = @transform_2, window_bounds = array<i64: 32, 512>}, {transform_indices = @transform_3, window_bounds = array<i64: 64, 512>}]} {
    %c0 = arith.constant 0 : index
    %c0_0 = arith.constant 0 : index
    %0 = vector.load %arg2[%c0, %c0_0] : memref<64x32xbf16, #tpu.memory_space<vmem>>, vector<64x32xbf16>
    %c0_1 = arith.constant 0 : index
    %c0_2 = arith.constant 0 : index
    %1 = vector.load %arg4[%c0_1, %c0_2] : memref<32x512xbf16, #tpu.memory_space<vmem>>, vector<32x512xbf16>
    %cst = arith.constant dense<0.000000e+00> : vector<64x512xf32>
    %2 = tpu.matmul %0, %1, %cst {dimension_numbers = #tpu.dot_dimension_numbers<[1], [0], [0], [1], [0, 0, 1, 1], [], []>} : vector<64x32xbf16>, vector<32x512xbf16>, vector<64x512xf32> -> vector<64x512xf32>
    %c0_3 = arith.constant 0 : index
    %c0_4 = arith.constant 0 : index
    %3 = vector.load %arg3[%c0_3, %c0_4] : memref<64x1xf32, #tpu.memory_space<vmem>>, vector<64x1xf32>
    %4 = vector.broadcast %3 : vector<64x1xf32> to vector<64x512xf32>
    %5 = arith.addf %2, %4 : vector<64x512xf32>
    %cst_5 = arith.constant 2.000000e-01 : f32
    %6 = vector.broadcast %cst_5 : f32 to vector<64x512xf32>
    %7 = arith.mulf %6, %5 : vector<64x512xf32>
    %8 = arith.maximumf %5, %7 : vector<64x512xf32>
    %9 = arith.truncf %8 : vector<64x512xf32> to vector<64x512xbf16>
    %c0_6 = arith.constant 0 : index
    %c0_7 = arith.constant 0 : index
    %10 = vector.load %arg5[%c0_6, %c0_7] : memref<64x512xbf16, #tpu.memory_space<vmem>>, vector<64x512xbf16>
    tpu.vector_store %arg5[%c0_6, %c0_7], %9 {strides = array<i32>} : memref<64x512xbf16, #tpu.memory_space<vmem>>, vector<64x512xbf16>,
    return
  }
  func.func @transform_0(%arg0: i32, %arg1: i32) -> (i32, i32) {
    %c0_i32 = arith.constant 0 : i32
    %c0_i32_0 = arith.constant 0 : i32
    return %arg1, %c0_i32 : i32, i32
  }
  func.func @transform_1(%arg0: i32, %arg1: i32) -> (i32, i32) {
    %c0_i32 = arith.constant 0 : i32
    %c0_i32_0 = arith.constant 0 : i32
    return %arg1, %c0_i32 : i32, i32
  }
  func.func @transform_2(%arg0: i32, %arg1: i32) -> (i32, i32) {
    %c0_i32 = arith.constant 0 : i32
    %c0_i32_0 = arith.constant 0 : i32
    return %c0_i32, %arg0 : i32, i32
  }
  func.func @transform_3(%arg0: i32, %arg1: i32) -> (i32, i32) {
    %c0_i32 = arith.constant 0 : i32
    return %arg1, %arg0 : i32, i32
  }
}

module attributes {stable_mosaic.version = 11 : i64} {
  func.func @_conv_kernel(%arg0: i32, %arg1: i32, %arg2: memref<64x1024xbf16, #tpu.memory_space<vmem>>, %arg3: memref<64x1024xbf16, #tpu.memory_space<vmem>>, %arg4: memref<1024x128xbf16, #tpu.memory_space<vmem>>, %arg5: memref<64x128xbf16, #tpu.memory_space<vmem>>) attributes {dimension_semantics = [#tpu.dimension_semantics<parallel>, #tpu.dimension_semantics<parallel>], iteration_bounds = array<i64: 1, 1>, scalar_prefetch = 0 : i64, scratch_operands = 0 : i64, tpu.core_type = #tpu.core_type<tc>, window_params = [{transform_indices = @transform_0, window_bounds = array<i64: 64, 1024>}, {transform_indices = @transform_1, window_bounds = array<i64: 64, 1024>}, {transform_indices = @transform_2, window_bounds = array<i64: 1024, 128>}, {transform_indices = @transform_3, window_bounds = array<i64: 64, 128>}]} {
    %c0 = arith.constant 0 : index
    %c0_0 = arith.constant 0 : index
    %0 = vector.load %arg2[%c0, %c0_0] : memref<64x1024xbf16, #tpu.memory_space<vmem>>, vector<64x1024xbf16>
    %c0_1 = arith.constant 0 : index
    %c0_2 = arith.constant 0 : index
    %1 = vector.load %arg4[%c0_1, %c0_2] : memref<1024x128xbf16, #tpu.memory_space<vmem>>, vector<1024x128xbf16>
    %cst = arith.constant dense<0.000000e+00> : vector<64x128xf32>
    %2 = tpu.matmul %0, %1, %cst {dimension_numbers = #tpu.dot_dimension_numbers<[1], [0], [0], [1], [0, 0, 1, 1], [], []>} : vector<64x1024xbf16>, vector<1024x128xbf16>, vector<64x128xf32> -> vector<64x128xf32>
    %cst_3 = arith.constant 2.000000e-01 : f32
    %3 = vector.broadcast %cst_3 : f32 to vector<64x128xf32>
    %4 = arith.mulf %3, %2 : vector<64x128xf32>
    %5 = arith.maximumf %2, %4 : vector<64x128xf32>
    %c0_4 = arith.constant 0 : index
    %c0_5 = arith.constant 0 : index
    %6 = vector.load %arg3[%c0_4, %c0_5] : memref<64x1024xbf16, #tpu.memory_space<vmem>>, vector<64x1024xbf16>
    %c0_6 = arith.constant 0 : index
    %c0_7 = arith.constant 0 : index
    %7 = vector.load %arg4[%c0_6, %c0_7] : memref<1024x128xbf16, #tpu.memory_space<vmem>>, vector<1024x128xbf16>
    %cst_8 = arith.constant dense<0.000000e+00> : vector<64x128xf32>
    %8 = tpu.matmul %6, %7, %cst_8 {dimension_numbers = #tpu.dot_dimension_numbers<[1], [0], [0], [1], [0, 0, 1, 1], [], []>} : vector<64x1024xbf16>, vector<1024x128xbf16>, vector<64x128xf32> -> vector<64x128xf32>
    %9 = arith.addf %5, %8 : vector<64x128xf32>
    %10 = arith.truncf %9 : vector<64x128xf32> to vector<64x128xbf16>
    %c0_9 = arith.constant 0 : index
    %c0_10 = arith.constant 0 : index
    %11 = vector.load %arg5[%c0_9, %c0_10] : memref<64x128xbf16, #tpu.memory_space<vmem>>, vector<64x128xbf16>
    tpu.vector_store %arg5[%c0_9, %c0_10], %10 {strides = array<i32>} : memref<64x128xbf16, #tpu.memory_space<vmem>>, vector<64x128xbf16>,
    return
  }
  func.func @transform_0(%arg0: i32, %arg1: i32) -> (i32, i32) {
    %c0_i32 = arith.constant 0 : i32
    %c0_i32_0 = arith.constant 0 : i32
    return %arg1, %c0_i32 : i32, i32
  }
  func.func @transform_1(%arg0: i32, %arg1: i32) -> (i32, i32) {
    %c0_i32 = arith.constant 0 : i32
    %c0_i32_0 = arith.constant 0 : i32
    return %arg1, %c0_i32 : i32, i32
  }
  func.func @transform_2(%arg0: i32, %arg1: i32) -> (i32, i32) {
    %c0_i32 = arith.constant 0 : i32
    %c0_i32_0 = arith.constant 0 : i32
    return %c0_i32, %arg0 : i32, i32
  }
  func.func @transform_3(%arg0: i32, %arg1: i32) -> (i32, i32) {
    %c0_i32 = arith.constant 0 : i32
    return %arg1, %arg0 : i32, i32
  }
}

module attributes {stable_mosaic.version = 11 : i64} {
  func.func @_conv_kernel(%arg0: i32, %arg1: i32, %arg2: memref<16x1024xbf16, #tpu.memory_space<vmem>>, %arg3: memref<16x1xf32, #tpu.memory_space<vmem>>, %arg4: memref<1024x128xbf16, #tpu.memory_space<vmem>>, %arg5: memref<16x128xbf16, #tpu.memory_space<vmem>>) attributes {dimension_semantics = [#tpu.dimension_semantics<parallel>, #tpu.dimension_semantics<parallel>], iteration_bounds = array<i64: 1, 1>, scalar_prefetch = 0 : i64, scratch_operands = 0 : i64, tpu.core_type = #tpu.core_type<tc>, window_params = [{transform_indices = @transform_0, window_bounds = array<i64: 16, 1024>}, {transform_indices = @transform_1, window_bounds = array<i64: 16, 1>}, {transform_indices = @transform_2, window_bounds = array<i64: 1024, 128>}, {transform_indices = @transform_3, window_bounds = array<i64: 16, 128>}]} {
    %c0 = arith.constant 0 : index
    %c0_0 = arith.constant 0 : index
    %0 = vector.load %arg2[%c0, %c0_0] : memref<16x1024xbf16, #tpu.memory_space<vmem>>, vector<16x1024xbf16>
    %c0_1 = arith.constant 0 : index
    %c0_2 = arith.constant 0 : index
    %1 = vector.load %arg4[%c0_1, %c0_2] : memref<1024x128xbf16, #tpu.memory_space<vmem>>, vector<1024x128xbf16>
    %cst = arith.constant dense<0.000000e+00> : vector<16x128xf32>
    %2 = tpu.matmul %0, %1, %cst {dimension_numbers = #tpu.dot_dimension_numbers<[1], [0], [0], [1], [0, 0, 1, 1], [], []>} : vector<16x1024xbf16>, vector<1024x128xbf16>, vector<16x128xf32> -> vector<16x128xf32>
    %c0_3 = arith.constant 0 : index
    %c0_4 = arith.constant 0 : index
    %3 = vector.load %arg3[%c0_3, %c0_4] : memref<16x1xf32, #tpu.memory_space<vmem>>, vector<16x1xf32>
    %4 = vector.broadcast %3 : vector<16x1xf32> to vector<16x128xf32>
    %5 = arith.addf %2, %4 : vector<16x128xf32>
    %cst_5 = arith.constant 2.000000e-01 : f32
    %6 = vector.broadcast %cst_5 : f32 to vector<16x128xf32>
    %7 = arith.mulf %6, %5 : vector<16x128xf32>
    %8 = arith.maximumf %5, %7 : vector<16x128xf32>
    %9 = arith.truncf %8 : vector<16x128xf32> to vector<16x128xbf16>
    %c0_6 = arith.constant 0 : index
    %c0_7 = arith.constant 0 : index
    %10 = vector.load %arg5[%c0_6, %c0_7] : memref<16x128xbf16, #tpu.memory_space<vmem>>, vector<16x128xbf16>
    tpu.vector_store %arg5[%c0_6, %c0_7], %9 {strides = array<i32>} : memref<16x128xbf16, #tpu.memory_space<vmem>>, vector<16x128xbf16>,
    return
  }
  func.func @transform_0(%arg0: i32, %arg1: i32) -> (i32, i32) {
    %c0_i32 = arith.constant 0 : i32
    %c0_i32_0 = arith.constant 0 : i32
    return %arg1, %c0_i32 : i32, i32
  }
  func.func @transform_1(%arg0: i32, %arg1: i32) -> (i32, i32) {
    %c0_i32 = arith.constant 0 : i32
    %c0_i32_0 = arith.constant 0 : i32
    return %arg1, %c0_i32 : i32, i32
  }
  func.func @transform_2(%arg0: i32, %arg1: i32) -> (i32, i32) {
    %c0_i32 = arith.constant 0 : i32
    %c0_i32_0 = arith.constant 0 : i32
    return %c0_i32, %arg0 : i32, i32
  }
  func.func @transform_3(%arg0: i32, %arg1: i32) -> (i32, i32) {
    %c0_i32 = arith.constant 0 : i32
    return %arg1, %arg0 : i32, i32
  }
}

</mosaic_0001>

<bundles_post_ra>
// kernel: resgan_forward.5
= control target key start
LH: loop header
LB: loop body
LE: loop exit
PB: predicated region body
PF: predicated region fallthrough
CT: control target
= control target key end

     0   :  { %8 = vsyncpa [#allocation3], 0  ;;  %s802_s0 = inlined_call_operand.hbm [shape: bf16[64,32], index: 0, kind: input, shape index: {}]   ;;  %s803_s1 = inlined_call_operand.hbm [shape: f32[64,1], index: 1, kind: input, shape index: {}]   ;;  %s804_s2 = inlined_call_operand.hbm [shape: bf16[32,512], index: 2, kind: input, shape index: {}]   ;;  %s805_s3 = inlined_call_operand.hbm [shape: bf16[64,512], index: 3, kind: output, shape index: {}]  }
   0x1   :  { %9 = vsyncpa [#allocation6], 0 }
   0x2   :  { %10 = vsyncpa [#allocation4], 0  ;;  %s709_s12 = smov [#allocation5]   ;;  %s615_s16 = scalar_lea.hbm %s803_s1, 1024 }
   0x3   :  { %s28_s13 = sshll.u32 %s709_s12, 4  ;;  %p616_p0 = scmp.ne.s32.totalorder %s803_s1, %s615_s16  ;;  %s29_s13 = int_to_ptr.vmem [resolvable:$true] %s28_s13 }
   0x4   :  { %p619_p1 = scmp.lt.u32.totalorder %s615_s16, %s803_s1 }
   0x6   :  { %p621_p2 = pnand %p619_p1, %p616_p0 }
   0x8   :  { %624 = shalt.err (!%p621_p2)
}
   0x9   :  { %s625_s21 = scalar_lea.vmem %s29_s13, 1024  ;;  %p630_p4 = scmp.lt.s32.totalorder %s29_s13, %s29_s13 }
   0xa   :  { %p626_p3 = scmp.ne.s32.totalorder %s29_s13, %s625_s21  ;;  %p631_p5 = scmp.lt.s32.totalorder %s625_s21, %s625_s21 }
   0xc   :  { %p632_p6 = por %p631_p5, %p630_p4 }
   0xe   :  { %p633_p7 = pnand %p632_p6, %p626_p3 }
  0x10   :  { %636 = shalt.err (!%p633_p7)
}
  0x11   :  { %s710_s22 = smov 128   ;;  %s711_s23 = smov 8  }
  0x12   :  { %34 = dma.hbm_to_vmem [thread:$0]  %s803_s1, 1024, %s29_s13, [#allocation6], %s710_s22, %s710_s22, %s711_s23  }
  0x13   :  { %s712_s26 = smov [#allocation2]   ;;  %s637_s30 = scalar_lea.hbm %s802_s0, 512 }
  0x14   :  { %s16_s27 = sshll.u32 %s712_s26, 4  ;;  %p638_p8 = scmp.ne.s32.totalorder %s802_s0, %s637_s30  ;;  %s17_s27 = int_to_ptr.vmem [resolvable:$true] %s16_s27 }
  0x15   :  { %p641_p9 = scmp.lt.u32.totalorder %s637_s30, %s802_s0 }
  0x17   :  { %p643_p10 = pnand %p641_p9, %p638_p8 }
  0x19   :  { %646 = shalt.err (!%p643_p10)
}
  0x1a   :  { %s647_s8 = scalar_lea.vmem %s17_s27, 512  ;;  %p652_p12 = scmp.lt.s32.totalorder %s17_s27, %s17_s27 }
  0x1b   :  { %p648_p11 = scmp.ne.s32.totalorder %s17_s27, %s647_s8  ;;  %p653_p13 = scmp.lt.s32.totalorder %s647_s8, %s647_s8 }
  0x1d   :  { %p654_p0 = por %p653_p13, %p652_p12 }
  0x1f   :  { %p655_p1 = pnand %p654_p0, %p648_p11 }
  0x21   :  { %658 = shalt.err (!%p655_p1)
}
  0x22   :  { %s713_s1 = smov 64   ;;  %s714_s9 = smov 4  }
  0x23   :  { %22 = dma.hbm_to_vmem [thread:$0]  %s802_s0, 512, %s17_s27, [#allocation3], %s713_s1, %s713_s1, %s714_s9  }
  0x24   :  { %s715_s12 = smov [#allocation7]   ;;  %s659_s16 = scalar_lea.hbm %s804_s2, 1024 }
  0x25   :  { %s40_s13 = sshll.u32 %s715_s12, 4  ;;  %p660_p2 = scmp.ne.s32.totalorder %s804_s2, %s659_s16  ;;  %s41_s13 = int_to_ptr.vmem [resolvable:$true] %s40_s13 }
  0x26   :  { %p663_p3 = scmp.lt.u32.totalorder %s659_s16, %s804_s2 }
  0x28   :  { %p665_p4 = pnand %p663_p3, %p660_p2 }
  0x2a   :  { %668 = shalt.err (!%p665_p4)
}
  0x2b   :  { %s669_s21 = scalar_lea.vmem %s41_s13, 1024  ;;  %p674_p6 = scmp.lt.s32.totalorder %s41_s13, %s41_s13 }
  0x2c   :  { %p670_p5 = scmp.ne.s32.totalorder %s41_s13, %s669_s21  ;;  %p675_p7 = scmp.lt.s32.totalorder %s669_s21, %s669_s21 }
  0x2e   :  { %p676_p8 = por %p675_p7, %p674_p6 }
  0x30   :  { %p677_p9 = pnand %p676_p8, %p670_p5 }
  0x32   :  { %680 = shalt.err (!%p677_p9)
}
  0x33   :  { %s716_s0 = smov 256   ;;  %s717_s22 = smov 16  }
  0x34   :  { %46 = dma.hbm_to_vmem [thread:$0]  %s804_s2, 1024, %s41_s13, [#allocation6], %s716_s0, %s716_s0, %s717_s22  }
  0x35   :  { %703 = dma.done.wait [#allocation3], 512  }
  0x36   :  { %704 = vsyncadd [#allocation3], 4294966784 }
  0x37   :  { %705 = dma.done.wait [#allocation6], 2048  }
  0x38   :  { %706 = vsyncadd [#allocation6], 4294965248  ;;  %v718_v0 = vmov 0   ;;  %v599_v1 = vld [vmem:[#allocation7 + $0x4] ss:$16 sps:$4 sm:$0xff]   ;;  %vm181_vm0 = vcmask 261120  }
  0x39   :  { %226 = vmatprep.mubr.bf16.mxu0 %v718_v0  ;;  %299 = vmatprep.mubr.bf16.mxu1 %v718_v0  ;;  %v601_v2 = vld [vmem:[#allocation7 + $0xc] ss:$16 sps:$4 sm:$0xff]   ;;  %v603_v3 = vld [vmem:[#allocation7] ss:$16 sps:$4 sm:$0xff]   ;;  %v604_v4 = vld [vmem:[#allocation7 + $0x8] ss:$16 sps:$4 sm:$0xff]  }
  0x3a   :  { %597 = vset.pattern.permute.xlu0 %v718_v0  ;;  %598 = vset.pattern.permute.xlu1 %v718_v0  ;;  %v605_v5 = vld [vmem:[#allocation7 + $0x24] ss:$16 sps:$4 sm:$0xff]   ;;  %v607_v6 = vld [vmem:[#allocation7 + $0x2c] ss:$16 sps:$4 sm:$0xff]   ;;  %v609_v7 = vld [vmem:[#allocation7 + $0x20] ss:$16 sps:$4 sm:$0xff]  }
  0x3b   :  { %194 = vmatprep.subr.bf16.mxu0 %v599_v1  ;;  %267 = vmatprep.subr.bf16.mxu1 %v601_v2  ;;  %v610_v8 = vld [vmem:[#allocation7 + $0x28] ss:$16 sps:$4 sm:$0xff]   ;;  %v611_v9 = vld [vmem:[#allocation2] sm:$0xff]   ;;  %v75_v11 = vld [vmem:[#allocation5 + $0x10] sm:$0xff]  ;;  %s719_s2 = smov [#allocation8]  }
  0x3c   :  { %195 = vmatpush1.bf16.msra.mxu0 %v603_v3  ;;  %268 = vmatpush1.bf16.msra.mxu1 %v604_v4  ;;  %v73_v10 = vld [vmem:[#allocation5] sm:$0xff]  ;;  %v74_v12 = vld [vmem:[#allocation5 + $0x8] sm:$0xff]  ;;  %v76_v13 = vld [vmem:[#allocation5 + $0x18] sm:$0xff]  ;;  %s521_s25 = sshll.u32 %s719_s2, 4  ;;  %s522_s25 = int_to_ptr.vmem [resolvable:$true] %s521_s25 }
  0x3d   :  { %196 = vmatprep.subr.bf16.mxu0 %v605_v5  ;;  %269 = vmatprep.subr.bf16.mxu1 %v607_v6  ;;  %v612_v14 = vld [vmem:[#allocation2 + $0x8] sm:$0xff]   ;;  %v77_v15 = vld [vmem:[#allocation5 + $0x20] sm:$0xff]  ;;  %v79_v17 = vld [vmem:[#allocation5 + $0x30] sm:$0xff]  ;;  %s681_s26 = scalar_lea.vmem %s522_s25, 2048  ;;  %p686_p11 = scmp.lt.s32.totalorder %s522_s25, %s522_s25 }
  0x3e   :  { %83 = vperm.xlu0 %597, %v73_v10   ;;  %93 = vperm.xlu1 %598, %v75_v11   ;;  %v78_v16 = vld [vmem:[#allocation5 + $0x28] sm:$0xff]  ;;  %v80_v18 = vld [vmem:[#allocation5 + $0x38] sm:$0xff]  ;;  %v613_v19 = vld [vmem:[#allocation2 + $0x10] sm:$0xff]   ;;  %p682_p10 = scmp.ne.s32.totalorder %s522_s25, %s681_s26  ;;  %p687_p12 = scmp.lt.s32.totalorder %s681_s26, %s681_s26 }
  0x3f   :  { %v614_v20 = vld [vmem:[#allocation2 + $0x18] sm:$0xff]  }
  0x40   :  { %197 = vmatpush1.bf16.msra.mxu0 %v609_v7  ;;  %270 = vmatpush1.bf16.msra.mxu1 %v610_v8  ;;  %p688_p13 = por %p687_p12, %p686_p11 }
  0x42   :  { %88 = vperm.xlu0 %597, %v74_v12   ;;  %98 = vperm.xlu1 %598, %v76_v13   ;;  %p689_p0 = pnand %p688_p13, %p682_p10 }
  0x43   :  { %546 = vmatmul.mubr.msk.bf16.vlgmr.msra.gmra.mrb[0].mxu0 %vm181_vm0, %v611_v9  ;;  %550 = vmatmul.mubr.msk.bf16.vlgmr.msra.gmra.mrb[0].mxu1 %vm181_vm0, %v611_v9 }
  0x44   :  { %236 = vmatprep.mubr.bf16.mxu0 %v718_v0  ;;  %309 = vmatprep.mubr.bf16.mxu1 %v718_v0 }
  0x46   :  { %103 = vperm.xlu0 %597, %v77_v15   ;;  %108 = vperm.xlu1 %598, %v78_v16  }
  0x4a   :  { %113 = vperm.xlu0 %597, %v79_v17   ;;  %118 = vperm.xlu1 %598, %v80_v18  }
  0x4b   :  { %547 = vmatmul.mubr.msk.bf16.gmra.mrb[4].mxu0 %vm181_vm0, %v612_v14  ;;  %551 = vmatmul.mubr.msk.bf16.gmra.mrb[4].mxu1 %vm181_vm0, %v612_v14 }
  0x4c   :  { %246 = vmatprep.mubr.bf16.mxu0 %v718_v0  ;;  %319 = vmatprep.mubr.bf16.mxu1 %v718_v0 }
  0x53   :  { %548 = vmatmul.mubr.msk.bf16.gmra.mrb[8].mxu0 %vm181_vm0, %v613_v19  ;;  %552 = vmatmul.mubr.msk.bf16.gmra.mrb[8].mxu1 %vm181_vm0, %v613_v19 }
  0x54   :  { %256 = vmatprep.mubr.bf16.mxu0 %v718_v0  ;;  %329 = vmatprep.mubr.bf16.mxu1 %v718_v0 }
  0x5b   :  { %549 = vmatmul.mubr.msk.bf16.gmra.mrb[12].mxu0 %vm181_vm0, %v614_v20  ;;  %553 = vmatmul.mubr.msk.bf16.gmra.mrb[12].mxu1 %vm181_vm0, %v614_v20 }
  0xbd   :  { %v84_v21 = vpop.permute.xlu0 %83  ;;  %v94_v23 = vpop.permute.xlu1 %93 }
  0xc1   :  { %v89_v22 = vpop.permute.xlu0 %88  ;;  %v99_v54 = vpop.permute.xlu1 %98 }
 0x116   :  { %v228_v24 = vpop.f32.mrb[0].mxu0  ;;  %v301_v25 = vpop.f32.mrb[0].mxu1 }
 0x117   :  { %v229_v26 = vadd.f32 %v228_v24, %v84_v21  ;;  %v302_v27 = vadd.f32 %v301_v25, %v84_v21  ;;  %v230_v28 = vpop.f32.mrb[1].mxu0  ;;  %v303_v29 = vpop.f32.mrb[1].mxu1 }
 0x118   :  { %v231_v30 = vadd.f32 %v230_v28, %v84_v21  ;;  %v304_v31 = vadd.f32 %v303_v29, %v84_v21  ;;  %v232_v32 = vpop.f32.mrb[2].mxu0  ;;  %v305_v33 = vpop.f32.mrb[2].mxu1 }
 0x119   :  { %v340_v34 = vmul.f32 0.2, %v229_v26  ;;  %v342_v35 = vmul.f32 0.2, %v302_v27  ;;  %v233_v36 = vadd.f32 %v232_v32, %v89_v22  ;;  %v306_v37 = vadd.f32 %v305_v33, %v89_v22  ;;  %v234_v38 = vpop.f32.mrb[3].mxu0  ;;  %v307_v39 = vpop.f32.mrb[3].mxu1 }
 0x11a   :  { %v341_v40 = vmul.f32 0.2, %v231_v30  ;;  %v343_v41 = vmul.f32 0.2, %v304_v31  ;;  %v235_v42 = vadd.f32 %v234_v38, %v89_v22  ;;  %v308_v43 = vadd.f32 %v307_v39, %v89_v22  ;;  %v104_v28 = vpop.permute.xlu0 %103 }
 0x11b   :  { %v372_v44 = vmax.f32 %v229_v26, %v340_v34  ;;  %v374_v45 = vmax.f32 %v302_v27, %v342_v35  ;;  %v344_v46 = vmul.f32 0.2, %v233_v36  ;;  %v346_v47 = vmul.f32 0.2, %v306_v37  ;;  %v109_v27 = vpop.permute.xlu1 %108 }
 0x11c   :  { %v373_v48 = vmax.f32 %v231_v30, %v341_v40  ;;  %v375_v49 = vmax.f32 %v304_v31, %v343_v41  ;;  %v345_v50 = vmul.f32 0.2, %v235_v42  ;;  %v347_v51 = vmul.f32 0.2, %v308_v43 }
 0x11d   :  { %v376_v52 = vmax.f32 %v233_v36, %v344_v46  ;;  %v378_v53 = vmax.f32 %v306_v37, %v346_v47 }
 0x11e   :  { %v570_v55 = vpack.c.bf16 %v373_v48, %v372_v44  ;;  %v571_v56 = vpack.c.bf16 %v375_v49, %v374_v45  ;;  %v377_v57 = vmax.f32 %v235_v42, %v345_v50  ;;  %v379_v58 = vmax.f32 %v308_v43, %v347_v51  ;;  %v238_v59 = vpop.f32.mrb[4].mxu0  ;;  %v311_v60 = vpop.f32.mrb[4].mxu1 }
 0x11f   :  { %v239_v61 = vadd.f32 %v238_v59, %v94_v23  ;;  %v312_v62 = vadd.f32 %v311_v60, %v94_v23  ;;  %v240_v63 = vpop.f32.mrb[5].mxu0  ;;  %v313_v0 = vpop.f32.mrb[5].mxu1 }
 0x120   :  { %500 = vst [vmem:[#allocation8] sm:$0xff] %v570_v55  ;;  %501 = vst [vmem:[#allocation8 + $0x8] sm:$0xff] %v571_v56  ;;  %v572_v1 = vpack.c.bf16 %v377_v57, %v376_v52  ;;  %v573_v2 = vpack.c.bf16 %v379_v58, %v378_v53  ;;  %v241_v3 = vadd.f32 %v240_v63, %v94_v23  ;;  %v242_v5 = vpop.f32.mrb[6].mxu0  ;;  %v315_v6 = vpop.f32.mrb[6].mxu1 }
 0x121   :  { %v314_v4 = vadd.f32 %v313_v0, %v94_v23  ;;  %v348_v7 = vmul.f32 0.2, %v239_v61  ;;  %v350_v8 = vmul.f32 0.2, %v312_v62  ;;  %v243_v9 = vadd.f32 %v242_v5, %v99_v54  ;;  %v244_v11 = vpop.f32.mrb[7].mxu0  ;;  %v317_v12 = vpop.f32.mrb[7].mxu1 }
 0x122   :  { %v316_v10 = vadd.f32 %v315_v6, %v99_v54  ;;  %502 = vst [vmem:[#allocation8 + $0x10] sm:$0xff] %v572_v1  ;;  %503 = vst [vmem:[#allocation8 + $0x18] sm:$0xff] %v573_v2  ;;  %v349_v13 = vmul.f32 0.2, %v241_v3  ;;  %v245_v15 = vadd.f32 %v244_v11, %v99_v54  ;;  %v318_v16 = vadd.f32 %v317_v12, %v99_v54  ;;  %v119_v63 = vpop.permute.xlu1 %118  ;;  %v114_v0 = vpop.permute.xlu0 %113 }
 0x123   :  { %v351_v14 = vmul.f32 0.2, %v314_v4  ;;  %v380_v17 = vmax.f32 %v239_v61, %v348_v7  ;;  %v382_v18 = vmax.f32 %v312_v62, %v350_v8  ;;  %v352_v19 = vmul.f32 0.2, %v243_v9 }
 0x124   :  { %v354_v20 = vmul.f32 0.2, %v316_v10  ;;  %v381_v21 = vmax.f32 %v241_v3, %v349_v13  ;;  %v353_v23 = vmul.f32 0.2, %v245_v15  ;;  %v355_v24 = vmul.f32 0.2, %v318_v16 }
 0x125   :  { %v383_v22 = vmax.f32 %v314_v4, %v351_v14  ;;  %v384_v25 = vmax.f32 %v243_v9, %v352_v19 }
 0x126   :  { %v386_v26 = vmax.f32 %v316_v10, %v354_v20  ;;  %v574_v29 = vpack.c.bf16 %v381_v21, %v380_v17  ;;  %v385_v31 = vmax.f32 %v245_v15, %v353_v23  ;;  %v387_v32 = vmax.f32 %v318_v16, %v355_v24  ;;  %v248_v33 = vpop.f32.mrb[8].mxu0  ;;  %v321_v34 = vpop.f32.mrb[8].mxu1 }
 0x127   :  { %v575_v30 = vpack.c.bf16 %v383_v22, %v382_v18  ;;  %v249_v35 = vadd.f32 %v248_v33, %v104_v28  ;;  %v322_v36 = vadd.f32 %v321_v34, %v104_v28  ;;  %v250_v37 = vpop.f32.mrb[9].mxu0  ;;  %v323_v38 = vpop.f32.mrb[9].mxu1 }
 0x128   :  { %504 = vst [vmem:[#allocation8 + $0x20] sm:$0xff] %v574_v29  ;;  %v576_v39 = vpack.c.bf16 %v385_v31, %v384_v25  ;;  %v577_v40 = vpack.c.bf16 %v387_v32, %v386_v26  ;;  %v251_v41 = vadd.f32 %v250_v37, %v104_v28  ;;  %v324_v42 = vadd.f32 %v323_v38, %v104_v28  ;;  %v252_v43 = vpop.f32.mrb[10].mxu0  ;;  %v325_v44 = vpop.f32.mrb[10].mxu1 }
 0x129   :  { %505 = vst [vmem:[#allocation8 + $0x28] sm:$0xff] %v575_v30  ;;  %v356_v45 = vmul.f32 0.2, %v249_v35  ;;  %v358_v46 = vmul.f32 0.2, %v322_v36  ;;  %v253_v47 = vadd.f32 %v252_v43, %v109_v27  ;;  %v326_v48 = vadd.f32 %v325_v44, %v109_v27  ;;  %v254_v49 = vpop.f32.mrb[11].mxu0 }
 0x12a   :  { %v327_v50 = vpop.f32.mrb[11].mxu1  ;;  %506 = vst [vmem:[#allocation8 + $0x30] sm:$0xff] %v576_v39  ;;  %507 = vst [vmem:[#allocation8 + $0x38] sm:$0xff] %v577_v40  ;;  %v357_v51 = vmul.f32 0.2, %v251_v41  ;;  %v255_v53 = vadd.f32 %v254_v49, %v109_v27 }
 0x12b   :  { %v359_v52 = vmul.f32 0.2, %v324_v42  ;;  %v328_v54 = vadd.f32 %v327_v50, %v109_v27  ;;  %v388_v55 = vmax.f32 %v249_v35, %v356_v45  ;;  %v390_v56 = vmax.f32 %v322_v36, %v358_v46 }
 0x12c   :  { %v360_v57 = vmul.f32 0.2, %v253_v47  ;;  %v362_v58 = vmul.f32 0.2, %v326_v48  ;;  %v389_v59 = vmax.f32 %v251_v41, %v357_v51  ;;  %v361_v61 = vmul.f32 0.2, %v255_v53 }
 0x12d   :  { %v391_v60 = vmax.f32 %v324_v42, %v359_v52  ;;  %v363_v62 = vmul.f32 0.2, %v328_v54 }
 0x12e   :  { %v392_v1 = vmax.f32 %v253_v47, %v360_v57  ;;  %v394_v2 = vmax.f32 %v326_v48, %v362_v58  ;;  %v578_v3 = vpack.c.bf16 %v389_v59, %v388_v55  ;;  %v393_v5 = vmax.f32 %v255_v53, %v361_v61  ;;  %v258_v7 = vpop.f32.mrb[12].mxu0  ;;  %v331_v8 = vpop.f32.mrb[12].mxu1 }
 0x12f   :  { %v579_v4 = vpack.c.bf16 %v391_v60, %v390_v56  ;;  %v395_v6 = vmax.f32 %v328_v54, %v363_v62  ;;  %v259_v9 = vadd.f32 %v258_v7, %v114_v0  ;;  %v332_v10 = vadd.f32 %v331_v8, %v114_v0  ;;  %v260_v11 = vpop.f32.mrb[13].mxu0  ;;  %v333_v12 = vpop.f32.mrb[13].mxu1 }
 0x130   :  { %508 = vst [vmem:[#allocation8 + $0x40] sm:$0xff] %v578_v3  ;;  %v580_v13 = vpack.c.bf16 %v393_v5, %v392_v1  ;;  %v261_v15 = vadd.f32 %v260_v11, %v114_v0  ;;  %v334_v16 = vadd.f32 %v333_v12, %v114_v0  ;;  %v262_v17 = vpop.f32.mrb[14].mxu0  ;;  %v335_v18 = vpop.f32.mrb[14].mxu1 }
 0x131   :  { %509 = vst [vmem:[#allocation8 + $0x48] sm:$0xff] %v579_v4  ;;  %v581_v14 = vpack.c.bf16 %v395_v6, %v394_v2  ;;  %v364_v19 = vmul.f32 0.2, %v259_v9  ;;  %v366_v20 = vmul.f32 0.2, %v332_v10  ;;  %v263_v21 = vadd.f32 %v262_v17, %v119_v63  ;;  %v264_v23 = vpop.f32.mrb[15].mxu0 }
 0x132   :  { %v336_v22 = vadd.f32 %v335_v18, %v119_v63  ;;  %v337_v24 = vpop.f32.mrb[15].mxu1  ;;  %510 = vst [vmem:[#allocation8 + $0x50] sm:$0xff] %v580_v13  ;;  %v365_v25 = vmul.f32 0.2, %v261_v15  ;;  %v367_v26 = vmul.f32 0.2, %v334_v16  ;;  %v265_v27 = vadd.f32 %v264_v23, %v119_v63 }
 0x133   :  { %511 = vst [vmem:[#allocation8 + $0x58] sm:$0xff] %v581_v14  ;;  %v338_v28 = vadd.f32 %v337_v24, %v119_v63  ;;  %v396_v29 = vmax.f32 %v259_v9, %v364_v19  ;;  %v398_v30 = vmax.f32 %v332_v10, %v366_v20  ;;  %v368_v31 = vmul.f32 0.2, %v263_v21 }
 0x134   :  { %v370_v32 = vmul.f32 0.2, %v336_v22  ;;  %v397_v33 = vmax.f32 %v261_v15, %v365_v25  ;;  %v399_v34 = vmax.f32 %v334_v16, %v367_v26  ;;  %v369_v35 = vmul.f32 0.2, %v265_v27 }
 0x135   :  { %v371_v36 = vmul.f32 0.2, %v338_v28  ;;  %v400_v37 = vmax.f32 %v263_v21, %v368_v31 }
 0x136   :  { %v402_v38 = vmax.f32 %v336_v22, %v370_v32  ;;  %v582_v39 = vpack.c.bf16 %v397_v33, %v396_v29  ;;  %v583_v40 = vpack.c.bf16 %v399_v34, %v398_v30  ;;  %v401_v41 = vmax.f32 %v265_v27, %v369_v35 }
 0x137   :  { %v403_v42 = vmax.f32 %v338_v28, %v371_v36 }
 0x138   :  { %512 = vst [vmem:[#allocation8 + $0x60] sm:$0xff] %v582_v39  ;;  %513 = vst [vmem:[#allocation8 + $0x68] sm:$0xff] %v583_v40  ;;  %v584_v43 = vpack.c.bf16 %v401_v41, %v400_v37 }
 0x139   :  { %v585_v44 = vpack.c.bf16 %v403_v42, %v402_v38 }
 0x13a   :  { %514 = vst [vmem:[#allocation8 + $0x70] sm:$0xff] %v584_v43 }
 0x13b   :  { %515 = vst [vmem:[#allocation8 + $0x78] sm:$0xff] %v585_v44 }
 0x13c   :  { %692 = shalt.err (!%p689_p0)
}
 0x13d   :  { %s693_s29 = scalar_lea.hbm %s805_s3, 2048 }
 0x13e   :  { %p694_p1 = scmp.ne.s32.totalorder %s805_s3, %s693_s29  ;;  %p697_p2 = scmp.lt.u32.totalorder %s693_s29, %s805_s3 }
 0x140   :  { %p699_p3 = pnand %p697_p2, %p694_p1 }
 0x142   :  { %702 = shalt.err (!%p699_p3)
}
 0x143   :  { %527 = dma.vmem_to_hbm [thread:$0]  %s522_s25, 2048, %s805_s3, [#allocation4], %s716_s0, %s716_s0, %s717_s22  }
 0x144   :  { %707 = dma.done.wait [#allocation4], 2048  }
 0x145   :  { %708 = vsyncadd [#allocation4], 4294965248 }
 0x146   :  { %531 = vsyncpa [#allocation3], 1 }
 0x147   :  { %532 = vsyncpa [#allocation6], 1 }
 0x148   :  { %533 = vsyncpa [#allocation4], 1 }

// kernel: resgan_forward.6
= control target key start
LH: loop header
LB: loop body
LE: loop exit
PB: predicated region body
PF: predicated region fallthrough
CT: control target
= control target key end

     0   :  { %8 = vsyncpa [#allocation3], 0  ;;  %s2606_s0 = inlined_call_operand.hbm [shape: bf16[64,1024], index: 0, kind: input, shape index: {}]   ;;  %s2607_s1 = inlined_call_operand.hbm [shape: bf16[64,1024], index: 1, kind: input, shape index: {}]   ;;  %s2608_s2 = inlined_call_operand.hbm [shape: bf16[1024,128], index: 2, kind: input, shape index: {}]   ;;  %s2609_s3 = inlined_call_operand.hbm [shape: bf16[64,128], index: 3, kind: output, shape index: {}]  }
   0x1   :  { %9 = vsyncpa [#allocation6], 0 }
   0x2   :  { %10 = vsyncpa [#allocation4], 0  ;;  %s2208_s12 = smov [#allocation5]   ;;  %s2209_s14 = smov [#allocation2]  }
   0x3   :  { %s28_s13 = sshll.u32 %s2208_s12, 4  ;;  %s16_s15 = sshll.u32 %s2209_s14, 4  ;;  %s29_s13 = int_to_ptr.vmem [resolvable:$true] %s28_s13  ;;  %s2236_s15 = int_to_ptr.vmem [resolvable:$true] %s16_s15 }
   0x4   :  { %s2114_s18 = scalar_lea.hbm %s2607_s1, 4096 }
   0x5   :  { %p2115_p0 = scmp.ne.s32.totalorder %s2607_s1, %s2114_s18  ;;  %p2118_p1 = scmp.lt.u32.totalorder %s2114_s18, %s2607_s1 }
   0x7   :  { %p2120_p2 = pnand %p2118_p1, %p2115_p0 }
   0x9   :  { %2123 = shalt.err (!%p2120_p2)
}
   0xa   :  { %s2124_s23 = scalar_lea.vmem %s29_s13, 4096  ;;  %p2129_p4 = scmp.lt.s32.totalorder %s29_s13, %s29_s13 }
   0xb   :  { %p2125_p3 = scmp.ne.s32.totalorder %s29_s13, %s2124_s23  ;;  %p2130_p5 = scmp.lt.s32.totalorder %s2124_s23, %s2124_s23 }
   0xd   :  { %p2131_p6 = por %p2130_p5, %p2129_p4 }
   0xf   :  { %p2132_p7 = pnand %p2131_p6, %p2125_p3 }
  0x11   :  { %2135 = shalt.err (!%p2132_p7)
}
  0x12   :  { %s2210_s24 = smov 512   ;;  %s2211_s25 = smov 32  }
  0x13   :  { %34 = dma.hbm_to_vmem [thread:$0]  %s2607_s1, 4096, %s29_s13, [#allocation6], %s2210_s24, %s2210_s24, %s2211_s25  }
  0x14   :  { %s2136_s30 = scalar_lea.hbm %s2606_s0, 4096 }
  0x15   :  { %p2137_p8 = scmp.ne.s32.totalorder %s2606_s0, %s2136_s30  ;;  %p2140_p9 = scmp.lt.u32.totalorder %s2136_s30, %s2606_s0 }
  0x17   :  { %p2142_p10 = pnand %p2140_p9, %p2137_p8 }
  0x19   :  { %2145 = shalt.err (!%p2142_p10)
}
  0x1a   :  { %s2146_s8 = scalar_lea.vmem %s2236_s15, 4096  ;;  %p2151_p12 = scmp.lt.s32.totalorder %s2236_s15, %s2236_s15 }
  0x1b   :  { %p2147_p11 = scmp.ne.s32.totalorder %s2236_s15, %s2146_s8  ;;  %p2152_p13 = scmp.lt.s32.totalorder %s2146_s8, %s2146_s8 }
  0x1d   :  { %p2153_p0 = por %p2152_p13, %p2151_p12 }
  0x1f   :  { %p2154_p1 = pnand %p2153_p0, %p2147_p11 }
  0x21   :  { %2157 = shalt.err (!%p2154_p1)
}
  0x22   :  { %22 = dma.hbm_to_vmem [thread:$0]  %s2606_s0, 4096, %s2236_s15, [#allocation3], %s2210_s24, %s2210_s24, %s2211_s25  }
  0x23   :  { %s2212_s10 = smov [#allocation7]   ;;  %s2158_s14 = scalar_lea.hbm %s2608_s2, 8192 }
  0x24   :  { %s40_s11 = sshll.u32 %s2212_s10, 4  ;;  %p2159_p2 = scmp.ne.s32.totalorder %s2608_s2, %s2158_s14  ;;  %s41_s11 = int_to_ptr.vmem [resolvable:$true] %s40_s11 }
  0x25   :  { %p2162_p3 = scmp.lt.u32.totalorder %s2158_s14, %s2608_s2 }
  0x27   :  { %p2164_p4 = pnand %p2162_p3, %p2159_p2 }
  0x29   :  { %2167 = shalt.err (!%p2164_p4)
}
  0x2a   :  { %s2168_s20 = scalar_lea.vmem %s41_s11, 8192  ;;  %p2173_p6 = scmp.lt.s32.totalorder %s41_s11, %s41_s11 }
  0x2b   :  { %p2169_p5 = scmp.ne.s32.totalorder %s41_s11, %s2168_s20  ;;  %p2174_p7 = scmp.lt.s32.totalorder %s2168_s20, %s2168_s20 }
  0x2d   :  { %p2175_p8 = por %p2174_p7, %p2173_p6 }
  0x2f   :  { %p2176_p9 = pnand %p2175_p8, %p2169_p5 }
  0x31   :  { %2179 = shalt.err (!%p2176_p9)
}
  0x32   :  { %s2213_s0 = smov 64   ;;  %s2214_s15 = smov 4  }
  0x33   :  { %46 = dma.hbm_to_vmem [thread:$0]  %s2608_s2, 8192, %s41_s11, [#allocation6], %s2213_s0, %s2213_s0, %s2214_s15  }
  0x34   :  { %2202 = dma.done.wait [#allocation3], 4096  }
  0x35   :  { %2203 = vsyncadd [#allocation3], 4294963200 }
  0x36   :  { %2204 = dma.done.wait [#allocation6], 12288  }
  0x37   :  { %2205 = vsyncadd [#allocation6], 4294955008  ;;  %v2282_v0 = vld [vmem:[#allocation7 + $0x40] sm:$0xff]   ;;  %v2293_v4 = vld [vmem:[#allocation7 + $0x48] sm:$0xff]   ;;  %s2215_s2 = smov [#allocation8]  }
  0x38   :  { %v2284_v1 = vld [vmem:[#allocation7 + $0xc0] sm:$0xff]   ;;  %1722 = vmatprep.subr.bf16.mxu0 %v2282_v0  ;;  %v2296_v5 = vld [vmem:[#allocation7 + $0xc8] sm:$0xff]   ;;  %v2305_v8 = vld [vmem:[#allocation7 + $0x50] sm:$0xff]   ;;  %s1542_s23 = sshll.u32 %s2215_s2, 4  ;;  %s1543_s23 = int_to_ptr.vmem [resolvable:$true] %s1542_s23 }
  0x39   :  { %v2287_v2 = vld [vmem:[#allocation7] sm:$0xff]   ;;  %1762 = vmatprep.subr.bf16.mxu1 %v2284_v1  ;;  %v2299_v6 = vld [vmem:[#allocation7 + $0x8] sm:$0xff]   ;;  %v2308_v9 = vld [vmem:[#allocation7 + $0xd0] sm:$0xff]   ;;  %s2180_s24 = scalar_lea.vmem %s1543_s23, 512  ;;  %p2185_p11 = scmp.lt.s32.totalorder %s1543_s23, %s1543_s23 }
  0x3a   :  { %v2290_v3 = vld [vmem:[#allocation7 + $0x80] sm:$0xff]   ;;  %1723 = vmatpush3.bf16.msra.mxu0 %v2287_v2  ;;  %v2302_v7 = vld [vmem:[#allocation7 + $0x88] sm:$0xff]   ;;  %v2311_v10 = vld [vmem:[#allocation7 + $0x10] sm:$0xff]   ;;  %p2181_p10 = scmp.ne.s32.totalorder %s1543_s23, %s2180_s24  ;;  %p2186_p12 = scmp.lt.s32.totalorder %s2180_s24, %s2180_s24 }
  0x3b   :  { %1763 = vmatpush3.bf16.msra.mxu1 %v2290_v3  ;;  %1724 = vmatprep.subr.bf16.mxu0 %v2293_v4  ;;  %v2314_v11 = vld [vmem:[#allocation7 + $0x90] sm:$0xff]   ;;  %v2317_v12 = vld [vmem:[#allocation7 + $0x58] sm:$0xff]   ;;  %v2329_v16 = vld [vmem:[#allocation7 + $0x60] sm:$0xff]  }
  0x3c   :  { %1764 = vmatprep.subr.bf16.mxu1 %v2296_v5  ;;  %v2320_v13 = vld [vmem:[#allocation7 + $0xd8] sm:$0xff]   ;;  %v2332_v17 = vld [vmem:[#allocation7 + $0xe0] sm:$0xff]   ;;  %v2341_v20 = vld [vmem:[#allocation7 + $0x68] sm:$0xff]   ;;  %p2187_p13 = por %p2186_p12, %p2185_p11 }
  0x3d   :  { %v2323_v14 = vld [vmem:[#allocation7 + $0x18] sm:$0xff]   ;;  %v2335_v18 = vld [vmem:[#allocation7 + $0x20] sm:$0xff]   ;;  %v2344_v21 = vld [vmem:[#allocation7 + $0xe8] sm:$0xff]  }
  0x3e   :  { %1725 = vmatpush3.bf16.msra.mxu0 %v2299_v6  ;;  %v2326_v15 = vld [vmem:[#allocation7 + $0x98] sm:$0xff]   ;;  %v2338_v19 = vld [vmem:[#allocation7 + $0xa0] sm:$0xff]   ;;  %v2347_v22 = vld [vmem:[#allocation7 + $0x28] sm:$0xff]   ;;  %p2188_p0 = pnand %p2187_p13, %p2181_p10 }
  0x3f   :  { %1765 = vmatpush3.bf16.msra.mxu1 %v2302_v7  ;;  %1726 = vmatprep.subr.bf16.mxu0 %v2305_v8  ;;  %v2350_v23 = vld [vmem:[#allocation7 + $0xa8] sm:$0xff]   ;;  %v2353_v24 = vld [vmem:[#allocation7 + $0x70] sm:$0xff]   ;;  %v2365_v28 = vld [vmem:[#allocation7 + $0x78] sm:$0xff]  }
  0x40   :  { %1766 = vmatprep.subr.bf16.mxu1 %v2308_v9  ;;  %v2356_v25 = vld [vmem:[#allocation7 + $0xf0] sm:$0xff]   ;;  %v2368_v29 = vld [vmem:[#allocation7 + $0xf8] sm:$0xff]   ;;  %v57_v32 = vld [vmem:[#allocation2] sm:$0xff] }
  0x41   :  { %v2359_v26 = vld [vmem:[#allocation7 + $0x30] sm:$0xff]   ;;  %v2371_v30 = vld [vmem:[#allocation7 + $0x38] sm:$0xff]   ;;  %v61_v33 = vld [vmem:[#allocation2 + $0x20] sm:$0xff] }
  0x42   :  { %1727 = vmatpush3.bf16.msra.mxu0 %v2311_v10  ;;  %v2362_v27 = vld [vmem:[#allocation7 + $0xb0] sm:$0xff]   ;;  %v2374_v31 = vld [vmem:[#allocation7 + $0xb8] sm:$0xff]   ;;  %v58_v34 = vld [vmem:[#allocation2 + $0x8] sm:$0xff]  ;;  %v1555_v35 = vcombine.low %v57_v32, %v61_v33  ;;  %v1556_v36 = vcombine.high %v57_v32, %v61_v33 }
  0x43   :  { %1767 = vmatpush3.bf16.msra.mxu1 %v2314_v11  ;;  %1728 = vmatprep.subr.bf16.mxu0 %v2317_v12  ;;  %v62_v37 = vld [vmem:[#allocation2 + $0x28] sm:$0xff]  ;;  %v2378_v40 = vld [vmem:[#allocation7 + $0x140] sm:$0xff]   ;;  %v2402_v56 = vld [vmem:[#allocation7 + $0x150] sm:$0xff]  }
  0x44   :  { %1768 = vmatprep.subr.bf16.mxu1 %v2320_v13  ;;  %v1557_v38 = vcombine.low %v58_v34, %v62_v37  ;;  %v1558_v39 = vcombine.high %v58_v34, %v62_v37  ;;  %793 = vmatprep.mubr.bf16.mxu0 %v1556_v36  ;;  %v2380_v41 = vld [vmem:[#allocation7 + $0x1c0] sm:$0xff]   ;;  %v2389_v44 = vld [vmem:[#allocation7 + $0x148] sm:$0xff]   ;;  %v2404_v57 = vld [vmem:[#allocation7 + $0x1d0] sm:$0xff]  }
  0x45   :  { %v2382_v42 = vld [vmem:[#allocation7 + $0x100] sm:$0xff]   ;;  %v2392_v45 = vld [vmem:[#allocation7 + $0x1c8] sm:$0xff]   ;;  %v2406_v58 = vld [vmem:[#allocation7 + $0x110] sm:$0xff]  }
  0x46   :  { %1729 = vmatpush3.bf16.msra.mxu0 %v2323_v14  ;;  %858 = vmatprep.mubr.bf16.mxu1 %v1558_v39  ;;  %v2385_v43 = vld [vmem:[#allocation7 + $0x180] sm:$0xff]   ;;  %v2395_v46 = vld [vmem:[#allocation7 + $0x108] sm:$0xff]   ;;  %v2409_v59 = vld [vmem:[#allocation7 + $0x190] sm:$0xff]  }
  0x47   :  { %1769 = vmatpush3.bf16.msra.mxu1 %v2326_v15  ;;  %1730 = vmatprep.subr.bf16.mxu0 %v2329_v16  ;;  %v2398_v47 = vld [vmem:[#allocation7 + $0x188] sm:$0xff]   ;;  %v65_v48 = vld [vmem:[#allocation2 + $0x40] sm:$0xff]  ;;  %v2413_v60 = vld [vmem:[#allocation7 + $0x158] sm:$0xff]  }
  0x48   :  { %1770 = vmatprep.subr.bf16.mxu1 %v2332_v17  ;;  %v69_v49 = vld [vmem:[#allocation2 + $0x60] sm:$0xff]  ;;  %v66_v51 = vld [vmem:[#allocation2 + $0x48] sm:$0xff]  ;;  %v2416_v61 = vld [vmem:[#allocation7 + $0x1d8] sm:$0xff]  }
  0x49   :  { %v1564_v50 = vcombine.high %v65_v48, %v69_v49  ;;  %v70_v52 = vld [vmem:[#allocation2 + $0x68] sm:$0xff]  ;;  %v1563_v53 = vcombine.low %v65_v48, %v69_v49  ;;  %v2419_v62 = vld [vmem:[#allocation7 + $0x118] sm:$0xff]   ;;  %v73_v32 = vld [vmem:[#allocation2 + $0x80] sm:$0xff] }
  0x4a   :  { %1731 = vmatpush3.bf16.msra.mxu0 %v2335_v18  ;;  %v1566_v54 = vcombine.high %v66_v51, %v70_v52  ;;  %v1565_v55 = vcombine.low %v66_v51, %v70_v52  ;;  %v2422_v63 = vld [vmem:[#allocation7 + $0x198] sm:$0xff]   ;;  %v77_v33 = vld [vmem:[#allocation2 + $0xa0] sm:$0xff]  ;;  %v74_v34 = vld [vmem:[#allocation2 + $0x88] sm:$0xff] }
  0x4b   :  { %1771 = vmatpush3.bf16.msra.mxu1 %v2338_v19  ;;  %1732 = vmatprep.subr.bf16.mxu0 %v2341_v20  ;;  %v1572_v36 = vcombine.high %v73_v32, %v77_v33  ;;  %v2426_v48 = vld [vmem:[#allocation7 + $0x160] sm:$0xff]   ;;  %v2436_v52 = vld [vmem:[#allocation7 + $0x168] sm:$0xff]  }
  0x4c   :  { %1772 = vmatprep.subr.bf16.mxu1 %v2344_v21  ;;  %v2428_v49 = vld [vmem:[#allocation7 + $0x1e0] sm:$0xff]   ;;  %2627 = vst [vmem:[#allocation15_spill] sm:$0xff] %v2436_v52 }
  0x4d   :  { %2624 = vst [vmem:[#allocation12_spill] sm:$0xff] %v2428_v49  ;;  %v2432_v51 = vld [vmem:[#allocation7 + $0x1a0] sm:$0xff]  }
  0x4e   :  { %1733 = vmatpush3.bf16.msra.mxu0 %v2347_v22  ;;  %2626 = vst [vmem:[#allocation14_spill] sm:$0xff] %v2432_v51 }
  0x4f   :  { %1773 = vmatpush3.bf16.msra.mxu1 %v2350_v23  ;;  %1734 = vmatprep.subr.bf16.mxu0 %v2353_v24 }
  0x50   :  { %1774 = vmatprep.subr.bf16.mxu1 %v2356_v25 }
  0x52   :  { %1735 = vmatpush3.bf16.msra.mxu0 %v2359_v26 }
  0x53   :  { %1775 = vmatpush3.bf16.msra.mxu1 %v2362_v27  ;;  %1736 = vmatprep.subr.bf16.mxu0 %v2365_v28 }
  0x54   :  { %1776 = vmatprep.subr.bf16.mxu1 %v2368_v29 }
  0x56   :  { %1737 = vmatpush3.bf16.msra.mxu0 %v2371_v30 }
  0x57   :  { %1777 = vmatpush3.bf16.msra.mxu1 %v2374_v31  ;;  %1802 = vmatprep.subr.bf16.mxu0 %v2378_v40 }
  0x58   :  { %1842 = vmatprep.subr.bf16.mxu1 %v2380_v41 }
  0x59   :  { %794 = vmatmul.mubr.bf16.vlgmr.msra.gmra.mrb[0].mxu0 %v1555_v35  ;;  %v78_v35 = vld [vmem:[#allocation2 + $0xa8] sm:$0xff] }
  0x5a   :  { %859 = vmatmul.mubr.bf16.vlgmr.msra.gmra.mrb[0].mxu1 %v1557_v38  ;;  %1803 = vmatpush3.bf16.msra.mxu0 %v2382_v42  ;;  %v1574_v37 = vcombine.high %v74_v34, %v78_v35  ;;  %v1571_v38 = vcombine.low %v73_v32, %v77_v33  ;;  %v1573_v39 = vcombine.low %v74_v34, %v78_v35  ;;  %v81_v32 = vld [vmem:[#allocation2 + $0xc0] sm:$0xff]  ;;  %v82_v34 = vld [vmem:[#allocation2 + $0xc8] sm:$0xff] }
  0x5b   :  { %1843 = vmatpush3.bf16.msra.mxu1 %v2385_v43  ;;  %1804 = vmatprep.subr.bf16.mxu0 %v2389_v44  ;;  %v85_v33 = vld [vmem:[#allocation2 + $0xe0] sm:$0xff] }
  0x5c   :  { %1844 = vmatprep.subr.bf16.mxu1 %v2392_v45  ;;  %801 = vmatprep.mubr.bf16.mxu0 %v1564_v50  ;;  %v2430_v50 = vld [vmem:[#allocation7 + $0x120] sm:$0xff]   ;;  %v1580_v35 = vcombine.high %v81_v32, %v85_v33 }
  0x5d   :  { %866 = vmatprep.mubr.bf16.mxu1 %v1566_v54  ;;  %2625 = vst [vmem:[#allocation13_spill] sm:$0xff] %v2430_v50  ;;  %v2443_v54 = vld [vmem:[#allocation7 + $0x128] sm:$0xff]  }
  0x5e   :  { %1805 = vmatpush3.bf16.msra.mxu0 %v2395_v46  ;;  %2629 = vst [vmem:[#allocation17_spill] sm:$0xff] %v2443_v54 }
  0x5f   :  { %1845 = vmatpush3.bf16.msra.mxu1 %v2398_v47  ;;  %1806 = vmatprep.subr.bf16.mxu0 %v2402_v56 }
  0x60   :  { %1846 = vmatprep.subr.bf16.mxu1 %v2404_v57 }
  0x61   :  { %802 = vmatmul.mubr.bf16.gmra.mrb[4].mxu0 %v1563_v53  ;;  %v2440_v53 = vld [vmem:[#allocation7 + $0x1e8] sm:$0xff]  }
  0x62   :  { %867 = vmatmul.mubr.bf16.gmra.mrb[4].mxu1 %v1565_v55  ;;  %1807 = vmatpush3.bf16.msra.mxu0 %v2406_v58  ;;  %2628 = vst [vmem:[#allocation16_spill] sm:$0xff] %v2440_v53  ;;  %v2446_v55 = vld [vmem:[#allocation7 + $0x1a8] sm:$0xff]  }
  0x63   :  { %1847 = vmatpush3.bf16.msra.mxu1 %v2409_v59  ;;  %1808 = vmatprep.subr.bf16.mxu0 %v2413_v60  ;;  %2630 = vst [vmem:[#allocation18_spill] sm:$0xff] %v2446_v55 }
  0x64   :  { %1848 = vmatprep.subr.bf16.mxu1 %v2416_v61  ;;  %809 = vmatprep.mubr.bf16.mxu0 %v1572_v36  ;;  %v86_v36 = vld [vmem:[#allocation2 + $0xe8] sm:$0xff] }
  0x65   :  { %874 = vmatprep.mubr.bf16.mxu1 %v1574_v37  ;;  %v1579_v37 = vcombine.low %v81_v32, %v85_v33  ;;  %v2461_v32 = vld [vmem:[#allocation7 + $0x178] sm:$0xff]  }
  0x66   :  { %1809 = vmatpush3.bf16.msra.mxu0 %v2419_v62  ;;  %2635 = vst [vmem:[#allocation23_spill] sm:$0xff] %v2461_v32  ;;  %v2464_v33 = vld [vmem:[#allocation7 + $0x1f8] sm:$0xff]  }
  0x67   :  { %1849 = vmatpush3.bf16.msra.mxu1 %v2422_v63  ;;  %1810 = vmatprep.subr.bf16.mxu0 %v2426_v48  ;;  %2636 = vst [vmem:[#allocation24_spill] sm:$0xff] %v2464_v33 }
  0x68   :  { %1850 = vmatprep.subr.bf16.mxu1 %v2428_v49 }
  0x69   :  { %810 = vmatmul.mubr.bf16.gmra.mrb[8].mxu0 %v1571_v38  ;;  %v1582_v38 = vcombine.high %v82_v34, %v86_v36 }
  0x6a   :  { %875 = vmatmul.mubr.bf16.gmra.mrb[8].mxu1 %v1573_v39  ;;  %1811 = vmatpush3.bf16.msra.mxu0 %v2430_v50  ;;  %v1581_v39 = vcombine.low %v82_v34, %v86_v36  ;;  %v2467_v34 = vld [vmem:[#allocation7 + $0x138] sm:$0xff]   ;;  %v59_v36 = vld [vmem:[#allocation2 + $0x10] sm:$0xff] }
  0x6b   :  { %1851 = vmatpush3.bf16.msra.mxu1 %v2432_v51  ;;  %1812 = vmatprep.subr.bf16.mxu0 %v2436_v52  ;;  %v2450_v51 = vld [vmem:[#allocation7 + $0x170] sm:$0xff]   ;;  %2637 = vst [vmem:[#allocation25_spill] sm:$0xff] %v2467_v34  ;;  %v68_v50 = vld [vmem:[#allocation2 + $0x58] sm:$0xff] }
  0x6c   :  { %1852 = vmatprep.subr.bf16.mxu1 %v2440_v53  ;;  %2631 = vst [vmem:[#allocation19_spill] sm:$0xff] %v2450_v51  ;;  %817 = vmatprep.mubr.bf16.mxu0 %v1580_v35  ;;  %v2452_v52 = vld [vmem:[#allocation7 + $0x1f0] sm:$0xff]   ;;  %v2470_v35 = vld [vmem:[#allocation7 + $0x1b8] sm:$0xff]  }
  0x6d   :  { %2632 = vst [vmem:[#allocation20_spill] sm:$0xff] %v2452_v52  ;;  %882 = vmatprep.mubr.bf16.mxu1 %v1582_v38  ;;  %v2454_v53 = vld [vmem:[#allocation7 + $0x130] sm:$0xff]  }
  0x6e   :  { %1813 = vmatpush3.bf16.msra.mxu0 %v2443_v54  ;;  %2633 = vst [vmem:[#allocation21_spill] sm:$0xff] %v2454_v53  ;;  %v2457_v54 = vld [vmem:[#allocation7 + $0x1b0] sm:$0xff]  }
  0x6f   :  { %1853 = vmatpush3.bf16.msra.mxu1 %v2446_v55  ;;  %1814 = vmatprep.subr.bf16.mxu0 %v2450_v51  ;;  %2634 = vst [vmem:[#allocation22_spill] sm:$0xff] %v2457_v54  ;;  %v67_v51 = vld [vmem:[#allocation2 + $0x50] sm:$0xff] }
  0x70   :  { %1854 = vmatprep.subr.bf16.mxu1 %v2452_v52  ;;  %v64_v52 = vld [vmem:[#allocation2 + $0x38] sm:$0xff] }
  0x71   :  { %818 = vmatmul.mubr.bf16.gmra.mrb[12].mxu0 %v1579_v37  ;;  %v63_v37 = vld [vmem:[#allocation2 + $0x30] sm:$0xff] }
  0x72   :  { %883 = vmatmul.mubr.bf16.gmra.mrb[12].mxu1 %v1581_v39  ;;  %1815 = vmatpush3.bf16.msra.mxu0 %v2454_v53  ;;  %v1559_v38 = vcombine.low %v59_v36, %v63_v37  ;;  %v1560_v39 = vcombine.high %v59_v36, %v63_v37  ;;  %v60_v53 = vld [vmem:[#allocation2 + $0x18] sm:$0xff]  ;;  %v2644_v37 = vld [vmem:[#allocation18_spill] sm:$0xff] }
  0x73   :  { %1855 = vmatpush3.bf16.msra.mxu1 %v2457_v54  ;;  %1816 = vmatprep.subr.bf16.mxu0 %v2461_v32  ;;  %v1561_v54 = vcombine.low %v60_v53, %v64_v52  ;;  %v1562_v55 = vcombine.high %v60_v53, %v64_v52  ;;  %v71_v32 = vld [vmem:[#allocation2 + $0x70] sm:$0xff]  ;;  %v80_v36 = vld [vmem:[#allocation2 + $0xb8] sm:$0xff] }
  0x74   :  { %1856 = vmatprep.subr.bf16.mxu1 %v2464_v33  ;;  %v72_v33 = vld [vmem:[#allocation2 + $0x78] sm:$0xff]  ;;  %923 = vmatprep.mubr.bf16.mxu0 %v1560_v39  ;;  %v1568_v49 = vcombine.high %v67_v51, %v71_v32  ;;  %v75_v52 = vld [vmem:[#allocation2 + $0x90] sm:$0xff]  ;;  %v2646_v39 = vld [vmem:[#allocation20_spill] sm:$0xff] }
  0x75   :  { %988 = vmatprep.mubr.bf16.mxu1 %v1562_v55  ;;  %v79_v53 = vld [vmem:[#allocation2 + $0xb0] sm:$0xff]  ;;  %v76_v55 = vld [vmem:[#allocation2 + $0x98] sm:$0xff] }
  0x76   :  { %1817 = vmatpush3.bf16.msra.mxu0 %v2467_v34  ;;  %v1570_v34 = vcombine.high %v68_v50, %v72_v33 }
  0x77   :  { %1857 = vmatpush3.bf16.msra.mxu1 %v2470_v35  ;;  %1882 = vmatprep.subr.bf16.mxu0 %v2282_v0  ;;  %v1567_v0 = vcombine.low %v67_v51, %v71_v32 }
  0x78   :  { %1922 = vmatprep.subr.bf16.mxu1 %v2284_v1  ;;  %v1569_v1 = vcombine.low %v68_v50, %v72_v33  ;;  %v2641_v50 = vld [vmem:[#allocation15_spill] sm:$0xff] }
  0x79   :  { %924 = vmatmul.mubr.bf16.vlgmr.msra.gmra.mrb[16].mxu0 %v1559_v38  ;;  %v1040_v33 = vld [vmem:[#allocation5 + $0x18] sm:$0xff] }
  0x7a   :  { %989 = vmatmul.mubr.bf16.vlgmr.msra.gmra.mrb[16].mxu1 %v1561_v54  ;;  %1883 = vmatpush3.bf16.msra.mxu0 %v2287_v2  ;;  %v1576_v2 = vcombine.high %v75_v52, %v79_v53  ;;  %v1043_v54 = vld [vmem:[#allocation5 + $0x30] sm:$0xff]  ;;  %v2645_v38 = vld [vmem:[#allocation19_spill] sm:$0xff] }
  0x7b   :  { %1923 = vmatpush3.bf16.msra.mxu1 %v2290_v3  ;;  %1884 = vmatprep.subr.bf16.mxu0 %v2293_v4  ;;  %v1578_v3 = vcombine.high %v76_v55, %v80_v36  ;;  %v1575_v4 = vcombine.low %v75_v52, %v79_v53  ;;  %v2647_v53 = vld [vmem:[#allocation21_spill] sm:$0xff] }
  0x7c   :  { %1924 = vmatprep.subr.bf16.mxu1 %v2296_v5  ;;  %931 = vmatprep.mubr.bf16.mxu0 %v1568_v49  ;;  %v83_v5 = vld [vmem:[#allocation2 + $0xd0] sm:$0xff] }
  0x7d   :  { %996 = vmatprep.mubr.bf16.mxu1 %v1570_v34  ;;  %v2640_v49 = vld [vmem:[#allocation14_spill] sm:$0xff]  ;;  %v1044_v34 = vld [vmem:[#allocation5 + $0x38] sm:$0xff] }
  0x7e   :  { %1885 = vmatpush3.bf16.msra.mxu0 %v2299_v6  ;;  %v87_v6 = vld [vmem:[#allocation2 + $0xf0] sm:$0xff]  ;;  %v1658_v52 = vcombine.high %v1040_v33, %v1044_v34 }
  0x7f   :  { %1925 = vmatpush3.bf16.msra.mxu1 %v2302_v7  ;;  %1886 = vmatprep.subr.bf16.mxu0 %v2305_v8  ;;  %v1577_v7 = vcombine.low %v76_v55, %v80_v36  ;;  %v84_v8 = vld [vmem:[#allocation2 + $0xd8] sm:$0xff]  ;;  %v1047_v36 = vld [vmem:[#allocation5 + $0x50] sm:$0xff] }
  0x80   :  { %1926 = vmatprep.subr.bf16.mxu1 %v2308_v9  ;;  %v88_v9 = vld [vmem:[#allocation2 + $0xf8] sm:$0xff] }
  0x81   :  { %932 = vmatmul.mubr.bf16.gmra.mrb[20].mxu0 %v1567_v0  ;;  %v2649_v55 = vld [vmem:[#allocation23_spill] sm:$0xff] }
  0x82   :  { %997 = vmatmul.mubr.bf16.gmra.mrb[20].mxu1 %v1569_v1  ;;  %1887 = vmatpush3.bf16.msra.mxu0 %v2311_v10  ;;  %v1584_v10 = vcombine.high %v83_v5, %v87_v6  ;;  %v2648_v1 = vld [vmem:[#allocation22_spill] sm:$0xff] }
  0x83   :  { %1927 = vmatpush3.bf16.msra.mxu1 %v2314_v11  ;;  %1888 = vmatprep.subr.bf16.mxu0 %v2317_v12  ;;  %v1586_v11 = vcombine.high %v84_v8, %v88_v9  ;;  %v1583_v12 = vcombine.low %v83_v5, %v87_v6  ;;  %v1052_v5 = vld [vmem:[#allocation5 + $0x78] sm:$0xff] }
  0x84   :  { %1928 = vmatprep.subr.bf16.mxu1 %v2320_v13  ;;  %939 = vmatprep.mubr.bf16.mxu0 %v1576_v2  ;;  %v1037_v13 = vld [vmem:[#allocation5] sm:$0xff]  ;;  %v1051_v2 = vld [vmem:[#allocation5 + $0x70] sm:$0xff] }
  0x85   :  { %1004 = vmatprep.mubr.bf16.mxu1 %v1578_v3  ;;  %v2650_v3 = vld [vmem:[#allocation24_spill] sm:$0xff] }
  0x86   :  { %1889 = vmatpush3.bf16.msra.mxu0 %v2323_v14  ;;  %v1041_v14 = vld [vmem:[#allocation5 + $0x20] sm:$0xff] }
  0x87   :  { %1929 = vmatpush3.bf16.msra.mxu1 %v2326_v15  ;;  %1890 = vmatprep.subr.bf16.mxu0 %v2329_v16  ;;  %v1585_v15 = vcombine.low %v84_v8, %v88_v9  ;;  %v1038_v16 = vld [vmem:[#allocation5 + $0x8] sm:$0xff]  ;;  %v1657_v8 = vcombine.low %v1040_v33, %v1044_v34  ;;  %v1664_v9 = vcombine.high %v1047_v36, %v1051_v2 }
  0x88   :  { %1930 = vmatprep.subr.bf16.mxu1 %v2332_v17  ;;  %v1042_v17 = vld [vmem:[#allocation5 + $0x28] sm:$0xff] }
  0x89   :  { %940 = vmatmul.mubr.bf16.gmra.mrb[24].mxu0 %v1575_v4  ;;  %v1048_v4 = vld [vmem:[#allocation5 + $0x58] sm:$0xff] }
  0x8a   :  { %1005 = vmatmul.mubr.bf16.gmra.mrb[24].mxu1 %v1577_v7  ;;  %1891 = vmatpush3.bf16.msra.mxu0 %v2335_v18  ;;  %v1652_v18 = vcombine.high %v1037_v13, %v1041_v14  ;;  %v2651_v7 = vld [vmem:[#allocation25_spill] sm:$0xff] }
  0x8b   :  { %1931 = vmatpush3.bf16.msra.mxu1 %v2338_v19  ;;  %1892 = vmatprep.subr.bf16.mxu0 %v2341_v20  ;;  %v1654_v19 = vcombine.high %v1038_v16, %v1042_v17  ;;  %v1651_v20 = vcombine.low %v1037_v13, %v1041_v14  ;;  %v1056_v13 = vld [vmem:[#allocation5 + $0x98] sm:$0xff] }
  0x8c   :  { %1932 = vmatprep.subr.bf16.mxu1 %v2344_v21  ;;  %947 = vmatprep.mubr.bf16.mxu0 %v1584_v10  ;;  %v1045_v21 = vld [vmem:[#allocation5 + $0x40] sm:$0xff]  ;;  %v1666_v10 = vcombine.high %v1048_v4, %v1052_v5  ;;  %v1060_v14 = vld [vmem:[#allocation5 + $0xb8] sm:$0xff] }
  0x8d   :  { %1012 = vmatprep.mubr.bf16.mxu1 %v1586_v11  ;;  %v1055_v11 = vld [vmem:[#allocation5 + $0x90] sm:$0xff] }
  0x8e   :  { %1893 = vmatpush3.bf16.msra.mxu0 %v2347_v22  ;;  %v1049_v22 = vld [vmem:[#allocation5 + $0x60] sm:$0xff] }
  0x8f   :  { %1933 = vmatpush3.bf16.msra.mxu1 %v2350_v23  ;;  %1894 = vmatprep.subr.bf16.mxu0 %v2353_v24  ;;  %v1653_v23 = vcombine.low %v1038_v16, %v1042_v17  ;;  %v1046_v24 = vld [vmem:[#allocation5 + $0x48] sm:$0xff]  ;;  %v1665_v16 = vcombine.low %v1048_v4, %v1052_v5 }
  0x90   :  { %1934 = vmatprep.subr.bf16.mxu1 %v2356_v25  ;;  %v1050_v25 = vld [vmem:[#allocation5 + $0x68] sm:$0xff] }
  0x91   :  { %948 = vmatmul.mubr.bf16.gmra.mrb[28].mxu0 %v1583_v12  ;;  %v1059_v12 = vld [vmem:[#allocation5 + $0xb0] sm:$0xff] }
  0x92   :  { %1013 = vmatmul.mubr.bf16.gmra.mrb[28].mxu1 %v1585_v15  ;;  %1895 = vmatpush3.bf16.msra.mxu0 %v2359_v26  ;;  %v1660_v26 = vcombine.high %v1045_v21, %v1049_v22  ;;  %v1663_v15 = vcombine.low %v1047_v36, %v1051_v2  ;;  %v1672_v17 = vcombine.high %v1055_v11, %v1059_v12 }
  0x93   :  { %1935 = vmatpush3.bf16.msra.mxu1 %v2362_v27  ;;  %1896 = vmatprep.subr.bf16.mxu0 %v2365_v28  ;;  %v1662_v27 = vcombine.high %v1046_v24, %v1050_v25  ;;  %v1659_v28 = vcombine.low %v1045_v21, %v1049_v22  ;;  %v1068_v21 = vld [vmem:[#allocation5 + $0xf8] sm:$0xff]  ;;  %v1671_v22 = vcombine.low %v1055_v11, %v1059_v12 }
  0x94   :  { %1936 = vmatprep.subr.bf16.mxu1 %v2368_v29  ;;  %1261 = vmatprep.mubr.bf16.mxu0 %v1652_v18  ;;  %v1053_v29 = vld [vmem:[#allocation5 + $0x80] sm:$0xff]  ;;  %v1674_v18 = vcombine.high %v1056_v13, %v1060_v14 }
  0x95   :  { %1326 = vmatprep.mubr.bf16.mxu1 %v1654_v19  ;;  %v1063_v19 = vld [vmem:[#allocation5 + $0xd0] sm:$0xff] }
  0x96   :  { %1897 = vmatpush3.bf16.msra.mxu0 %v2371_v30  ;;  %v1057_v30 = vld [vmem:[#allocation5 + $0xa0] sm:$0xff] }
  0x97   :  { %1937 = vmatpush3.bf16.msra.mxu1 %v2374_v31  ;;  %1962 = vmatprep.subr.bf16.mxu0 %v2378_v40  ;;  %v1661_v31 = vcombine.low %v1046_v24, %v1050_v25  ;;  %v1054_v40 = vld [vmem:[#allocation5 + $0x88] sm:$0xff] }
  0x98   :  { %2002 = vmatprep.subr.bf16.mxu1 %v2380_v41  ;;  %v1058_v41 = vld [vmem:[#allocation5 + $0xa8] sm:$0xff] }
  0x99   :  { %1262 = vmatmul.mubr.bf16.vlgmr.msra.gmra.mrb[32].mxu0 %v1651_v20  ;;  %v1067_v20 = vld [vmem:[#allocation5 + $0xf0] sm:$0xff] }
  0x9a   :  { %1327 = vmatmul.mubr.bf16.vlgmr.msra.gmra.mrb[32].mxu1 %v1653_v23  ;;  %1963 = vmatpush3.bf16.msra.mxu0 %v2382_v42  ;;  %v1668_v42 = vcombine.high %v1053_v29, %v1057_v30  ;;  %v1673_v23 = vcombine.low %v1056_v13, %v1060_v14  ;;  %v1680_v24 = vcombine.high %v1063_v19, %v1067_v20 }
  0x9b   :  { %2003 = vmatpush3.bf16.msra.mxu1 %v2385_v43  ;;  %1964 = vmatprep.subr.bf16.mxu0 %v2389_v44  ;;  %v1670_v43 = vcombine.high %v1054_v40, %v1058_v41  ;;  %v1667_v44 = vcombine.low %v1053_v29, %v1057_v30 }
  0x9c   :  { %2004 = vmatprep.subr.bf16.mxu1 %v2392_v45  ;;  %1269 = vmatprep.mubr.bf16.mxu0 %v1660_v26  ;;  %v1061_v45 = vld [vmem:[#allocation5 + $0xc0] sm:$0xff]  ;;  %v1679_v26 = vcombine.low %v1063_v19, %v1067_v20 }
  0x9d   :  { %1334 = vmatprep.mubr.bf16.mxu1 %v1662_v27 }
  0x9e   :  { %1965 = vmatpush3.bf16.msra.mxu0 %v2395_v46  ;;  %v1065_v46 = vld [vmem:[#allocation5 + $0xe0] sm:$0xff] }
  0x9f   :  { %2005 = vmatpush3.bf16.msra.mxu1 %v2398_v47  ;;  %1966 = vmatprep.subr.bf16.mxu0 %v2402_v56  ;;  %v1669_v47 = vcombine.low %v1054_v40, %v1058_v41  ;;  %v1062_v56 = vld [vmem:[#allocation5 + $0xc8] sm:$0xff]  ;;  %v1675_v51 = vcombine.low %v1061_v45, %v1065_v46 }
  0xa0   :  { %2006 = vmatprep.subr.bf16.mxu1 %v2404_v57  ;;  %v1066_v57 = vld [vmem:[#allocation5 + $0xe8] sm:$0xff] }
  0xa1   :  { %1270 = vmatmul.mubr.bf16.gmra.mrb[36].mxu0 %v1659_v28  ;;  %v1677_v32 = vcombine.low %v1062_v56, %v1066_v57 }
  0xa2   :  { %1335 = vmatmul.mubr.bf16.gmra.mrb[36].mxu1 %v1661_v31  ;;  %1967 = vmatpush3.bf16.msra.mxu0 %v2406_v58  ;;  %v2638_v58 = vld [vmem:[#allocation12_spill] sm:$0xff] }
  0xa3   :  { %2007 = vmatpush3.bf16.msra.mxu1 %v2409_v59  ;;  %1968 = vmatprep.subr.bf16.mxu0 %v2413_v60  ;;  %v1676_v59 = vcombine.high %v1061_v45, %v1065_v46  ;;  %v1678_v60 = vcombine.high %v1062_v56, %v1066_v57 }
  0xa4   :  { %2008 = vmatprep.subr.bf16.mxu1 %v2416_v61  ;;  %1277 = vmatprep.mubr.bf16.mxu0 %v1668_v42  ;;  %v2639_v61 = vld [vmem:[#allocation13_spill] sm:$0xff] }
  0xa5   :  { %1342 = vmatprep.mubr.bf16.mxu1 %v1670_v43 }
  0xa6   :  { %1969 = vmatpush3.bf16.msra.mxu0 %v2419_v62  ;;  %v2642_v62 = vld [vmem:[#allocation16_spill] sm:$0xff] }
  0xa7   :  { %2009 = vmatpush3.bf16.msra.mxu1 %v2422_v63  ;;  %1970 = vmatprep.subr.bf16.mxu0 %v2426_v48  ;;  %v1039_v63 = vld [vmem:[#allocation5 + $0x10] sm:$0xff]  ;;  %v2643_v48 = vld [vmem:[#allocation17_spill] sm:$0xff] }
  0xa8   :  { %2010 = vmatprep.subr.bf16.mxu1 %v2638_v58  ;;  %v1656_v0 = vcombine.high %v1039_v63, %v1043_v54  ;;  %v1655_v6 = vcombine.low %v1039_v63, %v1043_v54 }
  0xa9   :  { %1278 = vmatmul.mubr.bf16.gmra.mrb[40].mxu0 %v1667_v44 }
  0xaa   :  { %1343 = vmatmul.mubr.bf16.gmra.mrb[40].mxu1 %v1669_v47  ;;  %1971 = vmatpush3.bf16.msra.mxu0 %v2639_v61 }
  0xab   :  { %2011 = vmatpush3.bf16.msra.mxu1 %v2640_v49  ;;  %1972 = vmatprep.subr.bf16.mxu0 %v2641_v50 }
  0xac   :  { %2012 = vmatprep.subr.bf16.mxu1 %v2642_v62  ;;  %1285 = vmatprep.mubr.bf16.mxu0 %v1676_v59 }
  0xad   :  { %1350 = vmatprep.mubr.bf16.mxu1 %v1678_v60 }
  0xae   :  { %1973 = vmatpush3.bf16.msra.mxu0 %v2643_v48 }
  0xaf   :  { %2013 = vmatpush3.bf16.msra.mxu1 %v2644_v37  ;;  %1974 = vmatprep.subr.bf16.mxu0 %v2645_v38 }
  0xb0   :  { %2014 = vmatprep.subr.bf16.mxu1 %v2646_v39 }
  0xb1   :  { %1286 = vmatmul.mubr.bf16.gmra.mrb[44].mxu0 %v1675_v51 }
  0xb2   :  { %1351 = vmatmul.mubr.bf16.gmra.mrb[44].mxu1 %v1677_v32  ;;  %1975 = vmatpush3.bf16.msra.mxu0 %v2647_v53 }
  0xb3   :  { %2015 = vmatpush3.bf16.msra.mxu1 %v2648_v1  ;;  %1976 = vmatprep.subr.bf16.mxu0 %v2649_v55 }
  0xb4   :  { %2016 = vmatprep.subr.bf16.mxu1 %v2650_v3  ;;  %1391 = vmatprep.mubr.bf16.mxu0 %v1656_v0 }
  0xb5   :  { %1456 = vmatprep.mubr.bf16.mxu1 %v1658_v52 }
  0xb6   :  { %1977 = vmatpush3.bf16.msra.mxu0 %v2651_v7 }
  0xb7   :  { %2017 = vmatpush3.bf16.msra.mxu1 %v2470_v35  ;;  %v1064_v35 = vld [vmem:[#allocation5 + $0xd8] sm:$0xff] }
  0xb8   :  { %v1682_v25 = vcombine.high %v1064_v35, %v1068_v21  ;;  %v1681_v27 = vcombine.low %v1064_v35, %v1068_v21 }
  0xb9   :  { %1392 = vmatmul.mubr.bf16.vlgmr.msra.gmra.mrb[48].mxu0 %v1655_v6 }
  0xba   :  { %1457 = vmatmul.mubr.bf16.vlgmr.msra.gmra.mrb[48].mxu1 %v1657_v8  ;;  %1399 = vmatprep.mubr.bf16.mxu0 %v1664_v9 }
  0xbb   :  { %1464 = vmatprep.mubr.bf16.mxu1 %v1666_v10 }
  0xc1   :  { %1400 = vmatmul.mubr.bf16.gmra.mrb[52].mxu0 %v1663_v15 }
  0xc2   :  { %1465 = vmatmul.mubr.bf16.gmra.mrb[52].mxu1 %v1665_v16  ;;  %1407 = vmatprep.mubr.bf16.mxu0 %v1672_v17 }
  0xc3   :  { %1472 = vmatprep.mubr.bf16.mxu1 %v1674_v18 }
  0xc9   :  { %1408 = vmatmul.mubr.bf16.gmra.mrb[56].mxu0 %v1671_v22 }
  0xca   :  { %1473 = vmatmul.mubr.bf16.gmra.mrb[56].mxu1 %v1673_v23  ;;  %1415 = vmatprep.mubr.bf16.mxu0 %v1680_v24 }
  0xcb   :  { %1480 = vmatprep.mubr.bf16.mxu1 %v1682_v25 }
  0xd1   :  { %1416 = vmatmul.mubr.bf16.gmra.mrb[60].mxu0 %v1679_v26 }
  0xd2   :  { %1481 = vmatmul.mubr.bf16.gmra.mrb[60].mxu1 %v1681_v27 }
 0x12c   :  { %v1738_v28 = vpop.f32.mrb[0].mxu0 }
 0x12d   :  { %v1778_v29 = vpop.f32.mrb[0].mxu1  ;;  %v1739_v30 = vpop.f32.mrb[1].mxu0 }
 0x12e   :  { %v1740_v31 = vadd.f32 %v1739_v30, %v1738_v28  ;;  %v1779_v40 = vpop.f32.mrb[1].mxu1  ;;  %v1741_v41 = vpop.f32.mrb[2].mxu0 }
 0x12f   :  { %v1780_v42 = vadd.f32 %v1779_v40, %v1778_v29  ;;  %v1781_v43 = vpop.f32.mrb[2].mxu1  ;;  %v1742_v44 = vpop.f32.mrb[3].mxu0 }
 0x130   :  { %v1743_v45 = vadd.f32 %v1742_v44, %v1741_v41  ;;  %v1782_v46 = vpop.f32.mrb[3].mxu1 }
 0x131   :  { %v861_v47 = vadd.f32 %v1780_v42, %v1740_v31  ;;  %v1783_v56 = vadd.f32 %v1782_v46, %v1781_v43 }
 0x133   :  { %v864_v57 = vadd.f32 %v1783_v56, %v1743_v45 }
 0x134   :  { %v1744_v58 = vpop.f32.mrb[4].mxu0 }
 0x135   :  { %v1784_v59 = vpop.f32.mrb[4].mxu1  ;;  %v1745_v60 = vpop.f32.mrb[5].mxu0 }
 0x136   :  { %v1746_v61 = vadd.f32 %v1745_v60, %v1744_v58  ;;  %v1785_v49 = vpop.f32.mrb[5].mxu1  ;;  %v1747_v50 = vpop.f32.mrb[6].mxu0 }
 0x137   :  { %v1786_v62 = vadd.f32 %v1785_v49, %v1784_v59  ;;  %v1787_v51 = vpop.f32.mrb[6].mxu1  ;;  %v1748_v63 = vpop.f32.mrb[7].mxu0 }
 0x138   :  { %v1749_v54 = vadd.f32 %v1748_v63, %v1747_v50  ;;  %v1788_v48 = vpop.f32.mrb[7].mxu1 }
 0x139   :  { %v869_v32 = vadd.f32 %v1786_v62, %v1746_v61  ;;  %v1789_v33 = vadd.f32 %v1788_v48, %v1787_v51 }
 0x13b   :  { %v872_v34 = vadd.f32 %v1789_v33, %v1749_v54 }
 0x13c   :  { %v1750_v37 = vpop.f32.mrb[8].mxu0 }
 0x13d   :  { %v1790_v38 = vpop.f32.mrb[8].mxu1  ;;  %v1751_v39 = vpop.f32.mrb[9].mxu0 }
 0x13e   :  { %v1791_v0 = vpop.f32.mrb[9].mxu1  ;;  %v1752_v52 = vadd.f32 %v1751_v39, %v1750_v37  ;;  %v1753_v1 = vpop.f32.mrb[10].mxu0 }
 0x13f   :  { %v1792_v53 = vadd.f32 %v1791_v0, %v1790_v38  ;;  %v1793_v55 = vpop.f32.mrb[10].mxu1  ;;  %v1754_v36 = vpop.f32.mrb[11].mxu0 }
 0x140   :  { %v1794_v2 = vpop.f32.mrb[11].mxu1  ;;  %v1755_v4 = vadd.f32 %v1754_v36, %v1753_v1 }
 0x141   :  { %v877_v3 = vadd.f32 %v1792_v53, %v1752_v52  ;;  %v1795_v5 = vadd.f32 %v1794_v2, %v1793_v55 }
 0x143   :  { %v880_v6 = vadd.f32 %v1795_v5, %v1755_v4 }
 0x144   :  { %v1756_v7 = vpop.f32.mrb[12].mxu0 }
 0x145   :  { %v1796_v8 = vpop.f32.mrb[12].mxu1  ;;  %v1757_v9 = vpop.f32.mrb[13].mxu0 }
 0x146   :  { %v1758_v10 = vadd.f32 %v1757_v9, %v1756_v7  ;;  %v1797_v11 = vpop.f32.mrb[13].mxu1  ;;  %v1759_v12 = vpop.f32.mrb[14].mxu0 }
 0x147   :  { %v1798_v13 = vadd.f32 %v1797_v11, %v1796_v8  ;;  %v1799_v14 = vpop.f32.mrb[14].mxu1  ;;  %v1760_v15 = vpop.f32.mrb[15].mxu0 }
 0x148   :  { %v1761_v16 = vadd.f32 %v1760_v15, %v1759_v12  ;;  %v1800_v17 = vpop.f32.mrb[15].mxu1 }
 0x149   :  { %v885_v18 = vadd.f32 %v1798_v13, %v1758_v10  ;;  %v1801_v19 = vadd.f32 %v1800_v17, %v1799_v14 }
 0x14b   :  { %v2538_v20 = vadd.f32 %v1801_v19, %v1761_v16 }
 0x14c   :  { %v1818_v35 = vpop.f32.mrb[16].mxu0 }
 0x14d   :  { %v1858_v21 = vpop.f32.mrb[16].mxu1  ;;  %v1819_v22 = vpop.f32.mrb[17].mxu0 }
 0x14e   :  { %v1820_v23 = vadd.f32 %v1819_v22, %v1818_v35  ;;  %v1859_v24 = vpop.f32.mrb[17].mxu1  ;;  %v1821_v25 = vpop.f32.mrb[18].mxu0 }
 0x14f   :  { %v1860_v26 = vadd.f32 %v1859_v24, %v1858_v21  ;;  %v1861_v27 = vpop.f32.mrb[18].mxu1  ;;  %v1822_v28 = vpop.f32.mrb[19].mxu0 }
 0x150   :  { %v926_v29 = vadd.f32 %v1820_v23, %v861_v47  ;;  %v1823_v30 = vadd.f32 %v1822_v28, %v1821_v25  ;;  %v1862_v31 = vpop.f32.mrb[19].mxu1 }
 0x151   :  { %v1863_v40 = vadd.f32 %v1862_v31, %v1861_v27 }
 0x152   :  { %v2540_v41 = vadd.f32 %v1860_v26, %v926_v29  ;;  %v929_v42 = vadd.f32 %v1823_v30, %v864_v57 }
 0x154   :  { %v2542_v43 = vadd.f32 %v1863_v40, %v929_v42  ;;  %v1824_v44 = vpop.f32.mrb[20].mxu0 }
 0x155   :  { %v1864_v45 = vpop.f32.mrb[20].mxu1  ;;  %v1825_v46 = vpop.f32.mrb[21].mxu0 }
 0x156   :  { %v1826_v56 = vadd.f32 %v1825_v46, %v1824_v44  ;;  %v1865_v58 = vpop.f32.mrb[21].mxu1  ;;  %v1827_v59 = vpop.f32.mrb[22].mxu0 }
 0x157   :  { %v1866_v60 = vadd.f32 %v1865_v58, %v1864_v45  ;;  %v1867_v61 = vpop.f32.mrb[22].mxu1  ;;  %v1828_v49 = vpop.f32.mrb[23].mxu0 }
 0x158   :  { %v934_v50 = vadd.f32 %v1826_v56, %v869_v32  ;;  %v1829_v62 = vadd.f32 %v1828_v49, %v1827_v59  ;;  %v1868_v47 = vpop.f32.mrb[23].mxu1 }
 0x159   :  { %v1869_v51 = vadd.f32 %v1868_v47, %v1867_v61 }
 0x15a   :  { %v2544_v63 = vadd.f32 %v1866_v60, %v934_v50  ;;  %v937_v54 = vadd.f32 %v1829_v62, %v872_v34 }
 0x15c   :  { %v2546_v48 = vadd.f32 %v1869_v51, %v937_v54  ;;  %v1830_v57 = vpop.f32.mrb[24].mxu0 }
 0x15d   :  { %v1870_v33 = vpop.f32.mrb[24].mxu1  ;;  %v1831_v37 = vpop.f32.mrb[25].mxu0 }
 0x15e   :  { %v1832_v38 = vadd.f32 %v1831_v37, %v1830_v57  ;;  %v1871_v39 = vpop.f32.mrb[25].mxu1  ;;  %v1833_v0 = vpop.f32.mrb[26].mxu0 }
 0x15f   :  { %v1872_v52 = vadd.f32 %v1871_v39, %v1870_v33  ;;  %v1873_v53 = vpop.f32.mrb[26].mxu1  ;;  %v1834_v1 = vpop.f32.mrb[27].mxu0 }
 0x160   :  { %v942_v55 = vadd.f32 %v1832_v38, %v877_v3  ;;  %v1835_v36 = vadd.f32 %v1834_v1, %v1833_v0  ;;  %v1874_v32 = vpop.f32.mrb[27].mxu1 }
 0x161   :  { %v1875_v2 = vadd.f32 %v1874_v32, %v1873_v53 }
 0x162   :  { %v2548_v4 = vadd.f32 %v1872_v52, %v942_v55  ;;  %v945_v5 = vadd.f32 %v1835_v36, %v880_v6 }
 0x164   :  { %v2550_v7 = vadd.f32 %v1875_v2, %v945_v5  ;;  %v1836_v34 = vpop.f32.mrb[28].mxu0 }
 0x165   :  { %v1876_v8 = vpop.f32.mrb[28].mxu1  ;;  %v1837_v9 = vpop.f32.mrb[29].mxu0 }
 0x166   :  { %v1838_v10 = vadd.f32 %v1837_v9, %v1836_v34  ;;  %v1877_v11 = vpop.f32.mrb[29].mxu1  ;;  %v1839_v12 = vpop.f32.mrb[30].mxu0 }
 0x167   :  { %v1878_v13 = vadd.f32 %v1877_v11, %v1876_v8  ;;  %v1879_v14 = vpop.f32.mrb[30].mxu1  ;;  %v1840_v15 = vpop.f32.mrb[31].mxu0 }
 0x168   :  { %v950_v16 = vadd.f32 %v1838_v10, %v885_v18  ;;  %v1841_v17 = vadd.f32 %v1840_v15, %v1839_v12  ;;  %v1880_v3 = vpop.f32.mrb[31].mxu1 }
 0x169   :  { %v1881_v19 = vadd.f32 %v1880_v3, %v1879_v14 }
 0x16a   :  { %v2552_v35 = vadd.f32 %v1878_v13, %v950_v16  ;;  %v953_v21 = vadd.f32 %v1841_v17, %v2538_v20 }
 0x16c   :  { %v2555_v6 = vadd.f32 %v1881_v19, %v953_v21  ;;  %v1898_v22 = vpop.f32.mrb[32].mxu0 }
 0x16d   :  { %v1938_v23 = vpop.f32.mrb[32].mxu1  ;;  %v1899_v24 = vpop.f32.mrb[33].mxu0 }
 0x16e   :  { %v1900_v25 = vadd.f32 %v1899_v24, %v1898_v22  ;;  %v1939_v26 = vpop.f32.mrb[33].mxu1  ;;  %v1901_v27 = vpop.f32.mrb[34].mxu0 }
 0x16f   :  { %v1940_v28 = vadd.f32 %v1939_v26, %v1938_v23  ;;  %v1941_v29 = vpop.f32.mrb[34].mxu1  ;;  %v1902_v30 = vpop.f32.mrb[35].mxu0 }
 0x170   :  { %v1903_v31 = vadd.f32 %v1902_v30, %v1901_v27  ;;  %v1942_v18 = vpop.f32.mrb[35].mxu1 }
 0x171   :  { %v1329_v40 = vadd.f32 %v1940_v28, %v1900_v25  ;;  %v1943_v42 = vadd.f32 %v1942_v18, %v1941_v29  ;;  %v1021_v25 = vmul.f32 0.2, %v2540_v41  ;;  %v1022_v18 = vmul.f32 0.2, %v2542_v43 }
 0x173   :  { %v1332_v44 = vadd.f32 %v1943_v42, %v1903_v31 }
 0x174   :  { %v1904_v45 = vpop.f32.mrb[36].mxu0 }
 0x175   :  { %v1944_v46 = vpop.f32.mrb[36].mxu1  ;;  %v1905_v56 = vpop.f32.mrb[37].mxu0 }
 0x176   :  { %v1906_v20 = vadd.f32 %v1905_v56, %v1904_v45  ;;  %v1945_v58 = vpop.f32.mrb[37].mxu1  ;;  %v1907_v59 = vpop.f32.mrb[38].mxu0 }
 0x177   :  { %v1946_v60 = vadd.f32 %v1945_v58, %v1944_v46  ;;  %v1947_v61 = vpop.f32.mrb[38].mxu1  ;;  %v1908_v49 = vpop.f32.mrb[39].mxu0 }
 0x178   :  { %v1909_v50 = vadd.f32 %v1908_v49, %v1907_v59  ;;  %v1948_v62 = vpop.f32.mrb[39].mxu1 }
 0x179   :  { %v2557_v47 = vadd.f32 %v1946_v60, %v1906_v20  ;;  %v1949_v51 = vadd.f32 %v1948_v62, %v1947_v61  ;;  %v1029_v20 = vmax.f32 %v2540_v41, %v1021_v25  ;;  %v1030_v60 = vmax.f32 %v2542_v43, %v1022_v18 }
 0x17a   :  { %v1024_v41 = vmul.f32 0.2, %v2546_v48 }
 0x17b   :  { %v2559_v54 = vadd.f32 %v1949_v51, %v1909_v50 }
 0x17c   :  { %v1910_v57 = vpop.f32.mrb[40].mxu0 }
 0x17d   :  { %v1950_v33 = vpop.f32.mrb[40].mxu1  ;;  %v1911_v37 = vpop.f32.mrb[41].mxu0 }
 0x17e   :  { %v1912_v38 = vadd.f32 %v1911_v37, %v1910_v57  ;;  %v1951_v39 = vpop.f32.mrb[41].mxu1  ;;  %v1913_v0 = vpop.f32.mrb[42].mxu0  ;;  %v1023_v57 = vmul.f32 0.2, %v2544_v63 }
 0x17f   :  { %v1952_v52 = vadd.f32 %v1951_v39, %v1950_v33  ;;  %v1953_v53 = vpop.f32.mrb[42].mxu1  ;;  %v1914_v1 = vpop.f32.mrb[43].mxu0 }
 0x180   :  { %v1915_v55 = vadd.f32 %v1914_v1, %v1913_v0  ;;  %v1954_v36 = vpop.f32.mrb[43].mxu1 }
 0x181   :  { %v2561_v32 = vadd.f32 %v1952_v52, %v1912_v38  ;;  %v1955_v2 = vadd.f32 %v1954_v36, %v1953_v53  ;;  %v1031_v36 = vmax.f32 %v2544_v63, %v1023_v57 }
 0x183   :  { %v2563_v5 = vadd.f32 %v1955_v2, %v1915_v55 }
 0x184   :  { %v1916_v34 = vpop.f32.mrb[44].mxu0 }
 0x185   :  { %v1956_v8 = vpop.f32.mrb[44].mxu1  ;;  %v1917_v9 = vpop.f32.mrb[45].mxu0 }
 0x186   :  { %v1918_v10 = vadd.f32 %v1917_v9, %v1916_v34  ;;  %v1957_v11 = vpop.f32.mrb[45].mxu1  ;;  %v1919_v12 = vpop.f32.mrb[46].mxu0 }
 0x187   :  { %v1958_v13 = vadd.f32 %v1957_v11, %v1956_v8  ;;  %v1959_v14 = vpop.f32.mrb[46].mxu1  ;;  %v1920_v15 = vpop.f32.mrb[47].mxu0  ;;  %v1032_v8 = vmax.f32 %v2546_v48, %v1024_v41 }
 0x188   :  { %v1921_v16 = vadd.f32 %v1920_v15, %v1919_v12  ;;  %v1960_v17 = vpop.f32.mrb[47].mxu1 }
 0x189   :  { %v2565_v3 = vadd.f32 %v1958_v13, %v1918_v10  ;;  %v1961_v19 = vadd.f32 %v1960_v17, %v1959_v14  ;;  %v1025_v14 = vmul.f32 0.2, %v2548_v4 }
 0x18b   :  { %v2567_v21 = vadd.f32 %v1961_v19, %v1921_v16 }
 0x18c   :  { %v1978_v22 = vpop.f32.mrb[48].mxu0 }
 0x18d   :  { %v2018_v23 = vpop.f32.mrb[48].mxu1  ;;  %v1979_v24 = vpop.f32.mrb[49].mxu0 }
 0x18e   :  { %v1980_v26 = vadd.f32 %v1979_v24, %v1978_v22  ;;  %v2019_v27 = vpop.f32.mrb[49].mxu1  ;;  %v1981_v28 = vpop.f32.mrb[50].mxu0 }
 0x18f   :  { %v2020_v29 = vadd.f32 %v2019_v27, %v2018_v23  ;;  %v2021_v30 = vpop.f32.mrb[50].mxu1  ;;  %v1982_v31 = vpop.f32.mrb[51].mxu0  ;;  %v1026_v23 = vmul.f32 0.2, %v2550_v7  ;;  %v1033_v27 = vmax.f32 %v2548_v4, %v1025_v14 }
 0x190   :  { %v1394_v42 = vadd.f32 %v1980_v26, %v1329_v40  ;;  %v1983_v45 = vadd.f32 %v1982_v31, %v1981_v28  ;;  %v2022_v46 = vpop.f32.mrb[51].mxu1 }
 0x191   :  { %v2023_v56 = vadd.f32 %v2022_v46, %v2021_v30  ;;  %v1034_v30 = vmax.f32 %v2550_v7, %v1026_v23 }
 0x192   :  { %v1459_v58 = vadd.f32 %v2020_v29, %v1394_v42  ;;  %v1397_v59 = vadd.f32 %v1983_v45, %v1332_v44 }
 0x194   :  { %v1489_v61 = vadd.f32 %v1459_v58, %v1029_v20  ;;  %v1462_v49 = vadd.f32 %v2023_v56, %v1397_v59  ;;  %v1984_v50 = vpop.f32.mrb[52].mxu0  ;;  %v1027_v56 = vmul.f32 0.2, %v2552_v35 }
 0x195   :  { %v2024_v62 = vpop.f32.mrb[52].mxu1  ;;  %v1985_v51 = vpop.f32.mrb[53].mxu0 }
 0x196   :  { %v1490_v33 = vadd.f32 %v1462_v49, %v1030_v60  ;;  %v1986_v37 = vadd.f32 %v1985_v51, %v1984_v50  ;;  %v2025_v38 = vpop.f32.mrb[53].mxu1  ;;  %v1987_v40 = vpop.f32.mrb[54].mxu0  ;;  %v1028_v49 = vmul.f32 0.2, %v2555_v6  ;;  %v1035_v57 = vmax.f32 %v2552_v35, %v1027_v56 }
 0x197   :  { %v2026_v39 = vadd.f32 %v2025_v38, %v2024_v62  ;;  %v2027_v0 = vpop.f32.mrb[54].mxu1  ;;  %v1988_v52 = vpop.f32.mrb[55].mxu0 }
 0x198   :  { %v1702_v53 = vpack.c.bf16 %v1490_v33, %v1489_v61  ;;  %v1402_v44 = vadd.f32 %v1986_v37, %v2557_v47  ;;  %v1989_v43 = vadd.f32 %v1988_v52, %v1987_v40  ;;  %v2028_v1 = vpop.f32.mrb[55].mxu1  ;;  %v1036_v38 = vmax.f32 %v2555_v6, %v1028_v49 }
 0x199   :  { %v2029_v55 = vadd.f32 %v2028_v1, %v2027_v0 }
 0x19a   :  { %1703 = vst [vmem:[#allocation8] sm:$0xff] %v1702_v53   ;;  %v1467_v2 = vadd.f32 %v2026_v39, %v1402_v44  ;;  %v1405_v34 = vadd.f32 %v1989_v43, %v2559_v54 }
 0x19c   :  { %v1491_v9 = vadd.f32 %v1467_v2, %v1031_v36  ;;  %v1470_v10 = vadd.f32 %v2029_v55, %v1405_v34  ;;  %v1990_v11 = vpop.f32.mrb[56].mxu0 }
 0x19d   :  { %v2030_v12 = vpop.f32.mrb[56].mxu1  ;;  %v1991_v13 = vpop.f32.mrb[57].mxu0 }
 0x19e   :  { %v1492_v15 = vadd.f32 %v1470_v10, %v1032_v8  ;;  %v1992_v47 = vadd.f32 %v1991_v13, %v1990_v11  ;;  %v2031_v16 = vpop.f32.mrb[57].mxu1  ;;  %v1993_v17 = vpop.f32.mrb[58].mxu0 }
 0x19f   :  { %v2032_v19 = vadd.f32 %v2031_v16, %v2030_v12  ;;  %v2033_v22 = vpop.f32.mrb[58].mxu1  ;;  %v1994_v63 = vpop.f32.mrb[59].mxu0 }
 0x1a0   :  { %v1707_v24 = vpack.c.bf16 %v1492_v15, %v1491_v9  ;;  %v1410_v54 = vadd.f32 %v1992_v47, %v2561_v32  ;;  %v1995_v48 = vadd.f32 %v1994_v63, %v1993_v17  ;;  %v2034_v25 = vpop.f32.mrb[59].mxu1 }
 0x1a1   :  { %v2035_v26 = vadd.f32 %v2034_v25, %v2033_v22 }
 0x1a2   :  { %1719 = vst [vmem:[#allocation8 + $0x8] sm:$0xff] %v1707_v24   ;;  %v1475_v28 = vadd.f32 %v2032_v19, %v1410_v54  ;;  %v1413_v29 = vadd.f32 %v1995_v48, %v2563_v5 }
 0x1a4   :  { %v1493_v31 = vadd.f32 %v1475_v28, %v1033_v27  ;;  %v1478_v18 = vadd.f32 %v2035_v26, %v1413_v29  ;;  %v1996_v42 = vpop.f32.mrb[60].mxu0 }
 0x1a5   :  { %v2036_v45 = vpop.f32.mrb[60].mxu1  ;;  %v1997_v46 = vpop.f32.mrb[61].mxu0 }
 0x1a6   :  { %v1494_v20 = vadd.f32 %v1478_v18, %v1034_v30  ;;  %v1998_v32 = vadd.f32 %v1997_v46, %v1996_v42  ;;  %v2037_v58 = vpop.f32.mrb[61].mxu1  ;;  %v1999_v59 = vpop.f32.mrb[62].mxu0 }
 0x1a7   :  { %v2038_v60 = vadd.f32 %v2037_v58, %v2036_v45  ;;  %v2039_v61 = vpop.f32.mrb[62].mxu1  ;;  %v2000_v4 = vpop.f32.mrb[63].mxu0 }
 0x1a8   :  { %v1712_v50 = vpack.c.bf16 %v1494_v20, %v1493_v31  ;;  %v1418_v5 = vadd.f32 %v1998_v32, %v2565_v3  ;;  %v2001_v7 = vadd.f32 %v2000_v4, %v1999_v59  ;;  %v2040_v62 = vpop.f32.mrb[63].mxu1 }
 0x1a9   :  { %v2041_v51 = vadd.f32 %v2040_v62, %v2039_v61 }
 0x1aa   :  { %1720 = vst [vmem:[#allocation8 + $0x10] sm:$0xff] %v1712_v50   ;;  %v1483_v33 = vadd.f32 %v2038_v60, %v1418_v5  ;;  %v1421_v37 = vadd.f32 %v2001_v7, %v2567_v21 }
 0x1ac   :  { %v1495_v40 = vadd.f32 %v1483_v33, %v1035_v57  ;;  %v1486_v39 = vadd.f32 %v2041_v51, %v1421_v37 }
 0x1ae   :  { %v1496_v0 = vadd.f32 %v1486_v39, %v1036_v38 }
 0x1b0   :  { %v1717_v52 = vpack.c.bf16 %v1496_v0, %v1495_v40 }
 0x1b2   :  { %1721 = vst [vmem:[#allocation8 + $0x18] sm:$0xff] %v1717_v52  }
 0x1b3   :  { %2191 = shalt.err (!%p2188_p0)
}
 0x1b4   :  { %s2192_s27 = scalar_lea.hbm %s2609_s3, 512 }
 0x1b5   :  { %p2193_p1 = scmp.ne.s32.totalorder %s2609_s3, %s2192_s27  ;;  %p2196_p2 = scmp.lt.u32.totalorder %s2192_s27, %s2609_s3 }
 0x1b7   :  { %p2198_p3 = pnand %p2196_p2, %p2193_p1 }
 0x1b9   :  { %2201 = shalt.err (!%p2198_p3)
}
 0x1ba   :  { %1548 = dma.vmem_to_hbm [thread:$0]  %s1543_s23, 512, %s2609_s3, [#allocation4], %s2213_s0, %s2213_s0, %s2214_s15  }
 0x1bb   :  { %2206 = dma.done.wait [#allocation4], 512  }
 0x1bc   :  { %2207 = vsyncadd [#allocation4], 4294966784 }
 0x1bd   :  { %1552 = vsyncpa [#allocation3], 1 }
 0x1be   :  { %1553 = vsyncpa [#allocation6], 1 }
 0x1bf   :  { %1554 = vsyncpa [#allocation4], 1 }

// kernel: resgan_forward.9
= control target key start
LH: loop header
LB: loop body
LE: loop exit
PB: predicated region body
PF: predicated region fallthrough
CT: control target
= control target key end

     0   :  { %8 = vsyncpa [#allocation3], 0  ;;  %s1249_s0 = inlined_call_operand.hbm [shape: bf16[16,1024], index: 0, kind: input, shape index: {}]   ;;  %s1250_s1 = inlined_call_operand.hbm [shape: f32[16,1], index: 1, kind: input, shape index: {}]   ;;  %s1251_s2 = inlined_call_operand.hbm [shape: bf16[1024,128], index: 2, kind: input, shape index: {}]   ;;  %s1252_s3 = inlined_call_operand.hbm [shape: bf16[16,128], index: 3, kind: output, shape index: {}]  }
   0x1   :  { %9 = vsyncpa [#allocation6], 0 }
   0x2   :  { %10 = vsyncpa [#allocation4], 0  ;;  %s1164_s12 = smov [#allocation5]   ;;  %s1070_s16 = scalar_lea.hbm %s1250_s1, 256 }
   0x3   :  { %s28_s13 = sshll.u32 %s1164_s12, 4  ;;  %p1071_p0 = scmp.ne.s32.totalorder %s1250_s1, %s1070_s16  ;;  %s29_s13 = int_to_ptr.vmem [resolvable:$true] %s28_s13 }
   0x4   :  { %p1074_p1 = scmp.lt.u32.totalorder %s1070_s16, %s1250_s1 }
   0x6   :  { %p1076_p2 = pnand %p1074_p1, %p1071_p0 }
   0x8   :  { %1079 = shalt.err (!%p1076_p2)
}
   0x9   :  { %s1080_s21 = scalar_lea.vmem %s29_s13, 256  ;;  %p1085_p4 = scmp.lt.s32.totalorder %s29_s13, %s29_s13 }
   0xa   :  { %p1081_p3 = scmp.ne.s32.totalorder %s29_s13, %s1080_s21  ;;  %p1086_p5 = scmp.lt.s32.totalorder %s1080_s21, %s1080_s21 }
   0xc   :  { %p1087_p6 = por %p1086_p5, %p1085_p4 }
   0xe   :  { %p1088_p7 = pnand %p1087_p6, %p1081_p3 }
  0x10   :  { %1091 = shalt.err (!%p1088_p7)
}
  0x11   :  { %s1165_s22 = smov 128   ;;  %s1166_s23 = smov 8  }
  0x12   :  { %34 = dma.hbm_to_vmem [thread:$0]  %s1250_s1, 256, %s29_s13, [#allocation6], %s1165_s22, %s1165_s22, %s1166_s23  }
  0x13   :  { %s1167_s26 = smov [#allocation2]   ;;  %s1092_s30 = scalar_lea.hbm %s1249_s0, 1024 }
  0x14   :  { %s16_s27 = sshll.u32 %s1167_s26, 4  ;;  %p1093_p8 = scmp.ne.s32.totalorder %s1249_s0, %s1092_s30  ;;  %s17_s27 = int_to_ptr.vmem [resolvable:$true] %s16_s27 }
  0x15   :  { %p1096_p9 = scmp.lt.u32.totalorder %s1092_s30, %s1249_s0 }
  0x17   :  { %p1098_p10 = pnand %p1096_p9, %p1093_p8 }
  0x19   :  { %1101 = shalt.err (!%p1098_p10)
}
  0x1a   :  { %s1102_s8 = scalar_lea.vmem %s17_s27, 1024  ;;  %p1107_p12 = scmp.lt.s32.totalorder %s17_s27, %s17_s27 }
  0x1b   :  { %p1103_p11 = scmp.ne.s32.totalorder %s17_s27, %s1102_s8  ;;  %p1108_p13 = scmp.lt.s32.totalorder %s1102_s8, %s1102_s8 }
  0x1d   :  { %p1109_p0 = por %p1108_p13, %p1107_p12 }
  0x1f   :  { %p1110_p1 = pnand %p1109_p0, %p1103_p11 }
  0x21   :  { %1113 = shalt.err (!%p1110_p1)
}
  0x22   :  { %s1168_s1 = smov 512   ;;  %s1169_s9 = smov 32  }
  0x23   :  { %22 = dma.hbm_to_vmem [thread:$0]  %s1249_s0, 1024, %s17_s27, [#allocation3], %s1168_s1, %s1168_s1, %s1169_s9  }
  0x24   :  { %s1170_s12 = smov [#allocation7]   ;;  %s1114_s16 = scalar_lea.hbm %s1251_s2, 8192 }
  0x25   :  { %s40_s13 = sshll.u32 %s1170_s12, 4  ;;  %p1115_p2 = scmp.ne.s32.totalorder %s1251_s2, %s1114_s16  ;;  %s41_s13 = int_to_ptr.vmem [resolvable:$true] %s40_s13 }
  0x26   :  { %p1118_p3 = scmp.lt.u32.totalorder %s1114_s16, %s1251_s2 }
  0x28   :  { %p1120_p4 = pnand %p1118_p3, %p1115_p2 }
  0x2a   :  { %1123 = shalt.err (!%p1120_p4)
}
  0x2b   :  { %s1124_s21 = scalar_lea.vmem %s41_s13, 8192  ;;  %p1129_p6 = scmp.lt.s32.totalorder %s41_s13, %s41_s13 }
  0x2c   :  { %p1125_p5 = scmp.ne.s32.totalorder %s41_s13, %s1124_s21  ;;  %p1130_p7 = scmp.lt.s32.totalorder %s1124_s21, %s1124_s21 }
  0x2e   :  { %p1131_p8 = por %p1130_p7, %p1129_p6 }
  0x30   :  { %p1132_p9 = pnand %p1131_p8, %p1125_p5 }
  0x32   :  { %1135 = shalt.err (!%p1132_p9)
}
  0x33   :  { %s1171_s0 = smov 64   ;;  %s1172_s22 = smov 4  }
  0x34   :  { %46 = dma.hbm_to_vmem [thread:$0]  %s1251_s2, 8192, %s41_s13, [#allocation6], %s1171_s0, %s1171_s0, %s1172_s22  }
  0x35   :  { %1158 = dma.done.wait [#allocation3], 1024  }
  0x36   :  { %1159 = vsyncadd [#allocation3], 4294966272 }
  0x37   :  { %1160 = dma.done.wait [#allocation6], 8448  }
  0x38   :  { %1161 = vsyncadd [#allocation6], 4294958848  ;;  %v1173_v0 = vmov 0   ;;  %v1006_v1 = vld [vmem:[#allocation7 + $0x40] sm:$0xff]   ;;  %v1010_v5 = vld [vmem:[#allocation7 + $0x48] sm:$0xff]   ;;  %s1174_s2 = smov [#allocation8]  }
  0x39   :  { %1005 = vset.pattern.permute.xlu0 %v1173_v0  ;;  %v1007_v2 = vld [vmem:[#allocation7 + $0xc0] sm:$0xff]   ;;  %906 = vmatprep.subr.bf16.mxu0 %v1006_v1  ;;  %v1011_v6 = vld [vmem:[#allocation7 + $0xc8] sm:$0xff]   ;;  %v1014_v9 = vld [vmem:[#allocation7 + $0x50] sm:$0xff]   ;;  %s812_s25 = sshll.u32 %s1174_s2, 4  ;;  %s813_s25 = int_to_ptr.vmem [resolvable:$true] %s812_s25 }
  0x3a   :  { %v1008_v3 = vld [vmem:[#allocation7] sm:$0xff]   ;;  %928 = vmatprep.subr.bf16.mxu1 %v1007_v2  ;;  %v1012_v7 = vld [vmem:[#allocation7 + $0x8] sm:$0xff]   ;;  %v1015_v10 = vld [vmem:[#allocation7 + $0xd0] sm:$0xff]   ;;  %s1136_s26 = scalar_lea.vmem %s813_s25, 128  ;;  %p1141_p11 = scmp.lt.s32.totalorder %s813_s25, %s813_s25 }
  0x3b   :  { %v1009_v4 = vld [vmem:[#allocation7 + $0x80] sm:$0xff]   ;;  %907 = vmatpush3.bf16.msra.mxu0 %v1008_v3  ;;  %v1013_v8 = vld [vmem:[#allocation7 + $0x88] sm:$0xff]   ;;  %v1016_v11 = vld [vmem:[#allocation7 + $0x10] sm:$0xff]   ;;  %p1137_p10 = scmp.ne.s32.totalorder %s813_s25, %s1136_s26  ;;  %p1142_p12 = scmp.lt.s32.totalorder %s1136_s26, %s1136_s26 }
  0x3c   :  { %929 = vmatpush3.bf16.msra.mxu1 %v1009_v4  ;;  %908 = vmatprep.subr.bf16.mxu0 %v1010_v5  ;;  %v1017_v12 = vld [vmem:[#allocation7 + $0x90] sm:$0xff]   ;;  %v1018_v13 = vld [vmem:[#allocation7 + $0x58] sm:$0xff]   ;;  %v1022_v17 = vld [vmem:[#allocation7 + $0x60] sm:$0xff]  }
  0x3d   :  { %930 = vmatprep.subr.bf16.mxu1 %v1011_v6  ;;  %v1019_v14 = vld [vmem:[#allocation7 + $0xd8] sm:$0xff]   ;;  %v1023_v18 = vld [vmem:[#allocation7 + $0xe0] sm:$0xff]   ;;  %v1026_v21 = vld [vmem:[#allocation7 + $0x68] sm:$0xff]   ;;  %p1143_p13 = por %p1142_p12, %p1141_p11 }
  0x3e   :  { %v1020_v15 = vld [vmem:[#allocation7 + $0x18] sm:$0xff]   ;;  %v1024_v19 = vld [vmem:[#allocation7 + $0x20] sm:$0xff]   ;;  %v1027_v22 = vld [vmem:[#allocation7 + $0xe8] sm:$0xff]  }
  0x3f   :  { %909 = vmatpush3.bf16.msra.mxu0 %v1012_v7  ;;  %v1021_v16 = vld [vmem:[#allocation7 + $0x98] sm:$0xff]   ;;  %v1025_v20 = vld [vmem:[#allocation7 + $0xa0] sm:$0xff]   ;;  %v1028_v23 = vld [vmem:[#allocation7 + $0x28] sm:$0xff]   ;;  %p1144_p0 = pnand %p1143_p13, %p1137_p10 }
  0x40   :  { %931 = vmatpush3.bf16.msra.mxu1 %v1013_v8  ;;  %910 = vmatprep.subr.bf16.mxu0 %v1014_v9  ;;  %v1029_v24 = vld [vmem:[#allocation7 + $0xa8] sm:$0xff]   ;;  %v1030_v25 = vld [vmem:[#allocation7 + $0x70] sm:$0xff]   ;;  %v1034_v29 = vld [vmem:[#allocation7 + $0x78] sm:$0xff]  }
  0x41   :  { %932 = vmatprep.subr.bf16.mxu1 %v1015_v10  ;;  %v1031_v26 = vld [vmem:[#allocation7 + $0xf0] sm:$0xff]   ;;  %v1035_v30 = vld [vmem:[#allocation7 + $0xf8] sm:$0xff]   ;;  %v1038_v41 = vld [vmem:[#allocation7 + $0x140] sm:$0xff]  }
  0x42   :  { %v1032_v27 = vld [vmem:[#allocation7 + $0x30] sm:$0xff]   ;;  %v1036_v31 = vld [vmem:[#allocation7 + $0x38] sm:$0xff]   ;;  %v1039_v42 = vld [vmem:[#allocation7 + $0x1c0] sm:$0xff]  }
  0x43   :  { %911 = vmatpush3.bf16.msra.mxu0 %v1016_v11  ;;  %v1033_v28 = vld [vmem:[#allocation7 + $0xb0] sm:$0xff]   ;;  %v1037_v32 = vld [vmem:[#allocation7 + $0xb8] sm:$0xff]   ;;  %v1040_v43 = vld [vmem:[#allocation7 + $0x100] sm:$0xff]  }
  0x44   :  { %933 = vmatpush3.bf16.msra.mxu1 %v1017_v12  ;;  %912 = vmatprep.subr.bf16.mxu0 %v1018_v13  ;;  %v57_v33 = vld [vmem:[#allocation2] sm:$0xff]  ;;  %v58_v35 = vld [vmem:[#allocation2 + $0x8] sm:$0xff]  ;;  %v1041_v44 = vld [vmem:[#allocation7 + $0x180] sm:$0xff]  }
  0x45   :  { %934 = vmatprep.subr.bf16.mxu1 %v1019_v14  ;;  %v61_v34 = vld [vmem:[#allocation2 + $0x20] sm:$0xff]  ;;  %v62_v38 = vld [vmem:[#allocation2 + $0x28] sm:$0xff]  ;;  %v1042_v45 = vld [vmem:[#allocation7 + $0x148] sm:$0xff]  }
  0x46   :  { %v825_v36 = vcombine.low %v57_v33, %v61_v34  ;;  %v826_v37 = vcombine.high %v57_v33, %v61_v34  ;;  %v827_v39 = vcombine.low %v58_v35, %v62_v38  ;;  %v828_v40 = vcombine.high %v58_v35, %v62_v38  ;;  %v1043_v46 = vld [vmem:[#allocation7 + $0x1c8] sm:$0xff]   ;;  %v1046_v49 = vld [vmem:[#allocation7 + $0x150] sm:$0xff]   ;;  %v1050_v53 = vld [vmem:[#allocation7 + $0x158] sm:$0xff]  }
  0x47   :  { %913 = vmatpush3.bf16.msra.mxu0 %v1020_v15  ;;  %v1044_v47 = vld [vmem:[#allocation7 + $0x108] sm:$0xff]   ;;  %v1047_v50 = vld [vmem:[#allocation7 + $0x1d0] sm:$0xff]   ;;  %v1051_v54 = vld [vmem:[#allocation7 + $0x1d8] sm:$0xff]  }
  0x48   :  { %935 = vmatpush3.bf16.msra.mxu1 %v1021_v16  ;;  %914 = vmatprep.subr.bf16.mxu0 %v1022_v17  ;;  %v1045_v48 = vld [vmem:[#allocation7 + $0x188] sm:$0xff]   ;;  %v1048_v51 = vld [vmem:[#allocation7 + $0x110] sm:$0xff]   ;;  %v1052_v55 = vld [vmem:[#allocation7 + $0x118] sm:$0xff]  }
  0x49   :  { %936 = vmatprep.subr.bf16.mxu1 %v1023_v18  ;;  %661 = vmatprep.mubr.bf16.mxu0 %v826_v37  ;;  %v1049_v52 = vld [vmem:[#allocation7 + $0x190] sm:$0xff]   ;;  %v1053_v56 = vld [vmem:[#allocation7 + $0x198] sm:$0xff]   ;;  %v1054_v57 = vld [vmem:[#allocation7 + $0x160] sm:$0xff]  }
  0x4a   :  { %702 = vmatprep.mubr.bf16.mxu1 %v828_v40  ;;  %v1055_v58 = vld [vmem:[#allocation7 + $0x1e0] sm:$0xff]   ;;  %v1058_v61 = vld [vmem:[#allocation7 + $0x168] sm:$0xff]   ;;  %v1062_v1 = vld [vmem:[#allocation7 + $0x170] sm:$0xff]  }
  0x4b   :  { %915 = vmatpush3.bf16.msra.mxu0 %v1024_v19  ;;  %v1056_v59 = vld [vmem:[#allocation7 + $0x120] sm:$0xff]   ;;  %v1059_v62 = vld [vmem:[#allocation7 + $0x1e8] sm:$0xff]   ;;  %v1063_v2 = vld [vmem:[#allocation7 + $0x1f0] sm:$0xff]  }
  0x4c   :  { %937 = vmatpush3.bf16.msra.mxu1 %v1025_v20  ;;  %916 = vmatprep.subr.bf16.mxu0 %v1026_v21  ;;  %v1057_v60 = vld [vmem:[#allocation7 + $0x1a0] sm:$0xff]   ;;  %v1060_v63 = vld [vmem:[#allocation7 + $0x128] sm:$0xff]   ;;  %v1064_v3 = vld [vmem:[#allocation7 + $0x130] sm:$0xff]  }
  0x4d   :  { %938 = vmatprep.subr.bf16.mxu1 %v1027_v22  ;;  %v1061_v0 = vld [vmem:[#allocation7 + $0x1a8] sm:$0xff]   ;;  %v1065_v4 = vld [vmem:[#allocation7 + $0x1b0] sm:$0xff]   ;;  %v1066_v5 = vld [vmem:[#allocation7 + $0x178] sm:$0xff]  }
  0x4e   :  { %v1067_v6 = vld [vmem:[#allocation7 + $0x1f8] sm:$0xff]   ;;  %v59_v9 = vld [vmem:[#allocation2 + $0x10] sm:$0xff]  ;;  %v60_v13 = vld [vmem:[#allocation2 + $0x18] sm:$0xff] }
  0x4f   :  { %917 = vmatpush3.bf16.msra.mxu0 %v1028_v23  ;;  %v1068_v7 = vld [vmem:[#allocation7 + $0x138] sm:$0xff]   ;;  %v63_v10 = vld [vmem:[#allocation2 + $0x30] sm:$0xff]  ;;  %v64_v14 = vld [vmem:[#allocation2 + $0x38] sm:$0xff] }
  0x50   :  { %939 = vmatpush3.bf16.msra.mxu1 %v1029_v24  ;;  %918 = vmatprep.subr.bf16.mxu0 %v1030_v25  ;;  %v1069_v8 = vld [vmem:[#allocation7 + $0x1b8] sm:$0xff]   ;;  %v829_v11 = vcombine.low %v59_v9, %v63_v10  ;;  %v830_v12 = vcombine.high %v59_v9, %v63_v10  ;;  %v193_v15 = vld [vmem:[#allocation5] sm:$0xff]  ;;  %v831_v16 = vcombine.low %v60_v13, %v64_v14 }
  0x51   :  { %940 = vmatprep.subr.bf16.mxu1 %v1031_v26  ;;  %v832_v17 = vcombine.high %v60_v13, %v64_v14  ;;  %197 = vperm.xlu0 %1005, %v193_v15   ;;  %v194_v18 = vld [vmem:[#allocation5 + $0x8] sm:$0xff] }
  0x53   :  { %919 = vmatpush3.bf16.msra.mxu0 %v1032_v27 }
  0x54   :  { %941 = vmatpush3.bf16.msra.mxu1 %v1033_v28  ;;  %920 = vmatprep.subr.bf16.mxu0 %v1034_v29 }
  0x55   :  { %942 = vmatprep.subr.bf16.mxu1 %v1035_v30  ;;  %202 = vperm.xlu0 %1005, %v194_v18  }
  0x57   :  { %921 = vmatpush3.bf16.msra.mxu0 %v1036_v31 }
  0x58   :  { %943 = vmatpush3.bf16.msra.mxu1 %v1037_v32  ;;  %950 = vmatprep.subr.bf16.mxu0 %v1038_v41 }
  0x59   :  { %972 = vmatprep.subr.bf16.mxu1 %v1039_v42 }
  0x5a   :  { %662 = vmatmul.mubr.bf16.vlgmr.msra.gmra.mrb[0].mxu0 %v825_v36 }
  0x5b   :  { %703 = vmatmul.mubr.bf16.vlgmr.msra.gmra.mrb[0].mxu1 %v827_v39  ;;  %951 = vmatpush3.bf16.msra.mxu0 %v1040_v43 }
  0x5c   :  { %973 = vmatpush3.bf16.msra.mxu1 %v1041_v44  ;;  %952 = vmatprep.subr.bf16.mxu0 %v1042_v45 }
  0x5d   :  { %974 = vmatprep.subr.bf16.mxu1 %v1043_v46  ;;  %743 = vmatprep.mubr.bf16.mxu0 %v830_v12 }
  0x5e   :  { %784 = vmatprep.mubr.bf16.mxu1 %v832_v17 }
  0x5f   :  { %953 = vmatpush3.bf16.msra.mxu0 %v1044_v47 }
  0x60   :  { %975 = vmatpush3.bf16.msra.mxu1 %v1045_v48  ;;  %954 = vmatprep.subr.bf16.mxu0 %v1046_v49 }
  0x61   :  { %976 = vmatprep.subr.bf16.mxu1 %v1047_v50 }
  0x63   :  { %955 = vmatpush3.bf16.msra.mxu0 %v1048_v51 }
  0x64   :  { %977 = vmatpush3.bf16.msra.mxu1 %v1049_v52  ;;  %956 = vmatprep.subr.bf16.mxu0 %v1050_v53 }
  0x65   :  { %978 = vmatprep.subr.bf16.mxu1 %v1051_v54 }
  0x67   :  { %957 = vmatpush3.bf16.msra.mxu0 %v1052_v55 }
  0x68   :  { %979 = vmatpush3.bf16.msra.mxu1 %v1053_v56  ;;  %958 = vmatprep.subr.bf16.mxu0 %v1054_v57 }
  0x69   :  { %980 = vmatprep.subr.bf16.mxu1 %v1055_v58 }
  0x6b   :  { %959 = vmatpush3.bf16.msra.mxu0 %v1056_v59 }
  0x6c   :  { %981 = vmatpush3.bf16.msra.mxu1 %v1057_v60  ;;  %960 = vmatprep.subr.bf16.mxu0 %v1058_v61 }
  0x6d   :  { %982 = vmatprep.subr.bf16.mxu1 %v1059_v62 }
  0x6f   :  { %961 = vmatpush3.bf16.msra.mxu0 %v1060_v63 }
  0x70   :  { %983 = vmatpush3.bf16.msra.mxu1 %v1061_v0  ;;  %962 = vmatprep.subr.bf16.mxu0 %v1062_v1 }
  0x71   :  { %984 = vmatprep.subr.bf16.mxu1 %v1063_v2 }
  0x73   :  { %963 = vmatpush3.bf16.msra.mxu0 %v1064_v3 }
  0x74   :  { %985 = vmatpush3.bf16.msra.mxu1 %v1065_v4  ;;  %964 = vmatprep.subr.bf16.mxu0 %v1066_v5 }
  0x75   :  { %986 = vmatprep.subr.bf16.mxu1 %v1067_v6 }
  0x77   :  { %965 = vmatpush3.bf16.msra.mxu0 %v1068_v7 }
  0x78   :  { %987 = vmatpush3.bf16.msra.mxu1 %v1069_v8 }
  0x7a   :  { %744 = vmatmul.mubr.bf16.vlgmr.msra.gmra.mrb[4].mxu0 %v829_v11 }
  0x7b   :  { %785 = vmatmul.mubr.bf16.vlgmr.msra.gmra.mrb[4].mxu1 %v831_v16 }
  0xd0   :  { %v198_v19 = vpop.permute.xlu0 %197 }
  0xd4   :  { %v203_v21 = vpop.permute.xlu0 %202 }
 0x12d   :  { %v922_v20 = vpop.f32.mrb[0].mxu0 }
 0x12e   :  { %v944_v22 = vpop.f32.mrb[0].mxu1  ;;  %v923_v23 = vpop.f32.mrb[1].mxu0 }
 0x12f   :  { %v924_v24 = vadd.f32 %v923_v23, %v922_v20  ;;  %v945_v25 = vpop.f32.mrb[1].mxu1  ;;  %v925_v26 = vpop.f32.mrb[2].mxu0 }
 0x130   :  { %v946_v27 = vadd.f32 %v945_v25, %v944_v22  ;;  %v947_v28 = vpop.f32.mrb[2].mxu1  ;;  %v926_v29 = vpop.f32.mrb[3].mxu0 }
 0x131   :  { %v664_v30 = vadd.f32 %v924_v24, %v198_v19  ;;  %v927_v31 = vadd.f32 %v926_v29, %v925_v26  ;;  %v948_v32 = vpop.f32.mrb[3].mxu1 }
 0x132   :  { %v949_v33 = vadd.f32 %v948_v32, %v947_v28 }
 0x133   :  { %v705_v34 = vadd.f32 %v946_v27, %v664_v30  ;;  %v667_v35 = vadd.f32 %v927_v31, %v203_v21 }
 0x135   :  { %v708_v36 = vadd.f32 %v949_v33, %v667_v35 }
 0x14d   :  { %v966_v37 = vpop.f32.mrb[4].mxu0 }
 0x14e   :  { %v988_v38 = vpop.f32.mrb[4].mxu1  ;;  %v967_v39 = vpop.f32.mrb[5].mxu0 }
 0x14f   :  { %v968_v40 = vadd.f32 %v967_v39, %v966_v37  ;;  %v989_v41 = vpop.f32.mrb[5].mxu1  ;;  %v969_v42 = vpop.f32.mrb[6].mxu0 }
 0x150   :  { %v990_v43 = vadd.f32 %v989_v41, %v988_v38  ;;  %v991_v44 = vpop.f32.mrb[6].mxu1  ;;  %v970_v45 = vpop.f32.mrb[7].mxu0 }
 0x151   :  { %v746_v46 = vadd.f32 %v968_v40, %v705_v34  ;;  %v971_v47 = vadd.f32 %v970_v45, %v969_v42  ;;  %v992_v48 = vpop.f32.mrb[7].mxu1 }
 0x152   :  { %v993_v49 = vadd.f32 %v992_v48, %v991_v44 }
 0x153   :  { %v787_v50 = vadd.f32 %v990_v43, %v746_v46  ;;  %v749_v51 = vadd.f32 %v971_v47, %v708_v36 }
 0x155   :  { %v793_v52 = vmul.f32 0.2, %v787_v50  ;;  %v790_v53 = vadd.f32 %v993_v49, %v749_v51 }
 0x157   :  { %v794_v54 = vmul.f32 0.2, %v790_v53  ;;  %v795_v55 = vmax.f32 %v787_v50, %v793_v52 }
 0x159   :  { %v796_v56 = vmax.f32 %v790_v53, %v794_v54 }
 0x15b   :  { %v904_v57 = vpack.c.bf16 %v796_v56, %v795_v55 }
 0x15d   :  { %905 = vst [vmem:[#allocation8] sm:$0xff] %v904_v57  }
 0x15e   :  { %1147 = shalt.err (!%p1144_p0)
}
 0x15f   :  { %s1148_s29 = scalar_lea.hbm %s1252_s3, 128 }
 0x160   :  { %p1149_p1 = scmp.ne.s32.totalorder %s1252_s3, %s1148_s29  ;;  %p1152_p2 = scmp.lt.u32.totalorder %s1148_s29, %s1252_s3 }
 0x162   :  { %p1154_p3 = pnand %p1152_p2, %p1149_p1 }
 0x164   :  { %1157 = shalt.err (!%p1154_p3)
}
 0x165   :  { %818 = dma.vmem_to_hbm [thread:$0]  %s813_s25, 128, %s1252_s3, [#allocation4], %s1171_s0, %s1171_s0, %s1172_s22  }
 0x166   :  { %1162 = dma.done.wait [#allocation4], 128  }
 0x167   :  { %1163 = vsyncadd [#allocation4], 4294967168 }
 0x168   :  { %822 = vsyncpa [#allocation3], 1 }
 0x169   :  { %823 = vsyncpa [#allocation6], 1 }
 0x16a   :  { %824 = vsyncpa [#allocation4], 1 }

</bundles_post_ra>
